<compile_context>
chip_gen: v6e
topology: v6e:2x2x1
jax: 0.10.0
libtpu: 0.0.40
codegen_flags: <defaults>
</compile_context>

<pallas_src>
import functools

import jax
import jax.numpy as jnp
from jax import lax
from jax.experimental import pallas as pl
from jax.experimental.pallas import tpu as pltpu


def _softmax_lastdim(x):
    """Numerically stable softmax; the divide goes to the EUP (approx reciprocal)."""
    m = jnp.max(x, axis=-1, keepdims=True)
    e = jnp.exp(x - m)
    return e * pl.reciprocal(jnp.sum(e, axis=-1, keepdims=True), approx=True)


# --------------------------------------------------------------------------
# Kernel A: per-window QKV projection + windowed self-attention.
#   grid = (batch, window-blocks).  One (TBw*N, dim) @ (dim, 3*inner) projection
#   per step, then a heads-only loop of window-batched attention einsums.
#   Outputs: window tokens (b, nwp, inner) f32 and feature maps already in the
#   head-major layout stage 2 wants: (b, heads, nwp, wsz2*dh) bf16.
# --------------------------------------------------------------------------
def _win_attn_kernel(x_ref, wqkv_ref, tok_ref, fm_ref,
                     *, heads, dim_head, n_tok, tbw, wsz2):
    inner = heads * dim_head
    x2 = x_ref[0, 0]                                                     # (TBw*N, dim) f32
    qkv = jnp.dot(x2, wqkv_ref[...], preferred_element_type=jnp.float32)  # (TBw*N, 3*inner)
    qkv = qkv.reshape(tbw, n_tok, 3 * inner)                             # one relayout / block

    for h in range(heads):                                               # heads <= 8: short unroll
        q = qkv[:, :, h * dim_head:(h + 1) * dim_head]                   # scale pre-folded
        k = qkv[:, :, inner + h * dim_head: inner + (h + 1) * dim_head]
        v = qkv[:, :, 2 * inner + h * dim_head: 2 * inner + (h + 1) * dim_head]
        # window-batched contractions on the last dims (no explicit transpose)
        dots = jnp.einsum('tnd,tmd->tnm', q, k,
                          preferred_element_type=jnp.float32)            # (TBw, N, N)
        attn = _softmax_lastdim(dots)                                    # dropout p=0 -> identity
        out_h = jnp.einsum('tnm,tmd->tnd', attn, v,
                           preferred_element_type=jnp.float32)           # (TBw, N, dh)
        # direct stores into the output blocks (no list/concatenate)
        tok_ref[0, :, h * dim_head:(h + 1) * dim_head] = (
            out_h[:, 0, :].astype(tok_ref.dtype))                        # (TBw, dh)
        fm_ref[0, h] = (
            out_h[:, 1:, :].reshape(tbw, wsz2 * dim_head).astype(fm_ref.dtype))


# --------------------------------------------------------------------------
# Kernel B (stage 2, fused with the 1x1 output conv), grid over batch:
#   per-head LayerNorm (segment matmuls) + GELU + single qk matmul +
#   inter-window attention + per-head aggregation + output projection + bias.
# --------------------------------------------------------------------------
def _stage2_kernel(tok_ref, fm_ref, g_ref, b_ref, wqk_ref, bqk_ref, wo_ref, bo_ref,
                   o_ref, *, heads, dim_head, nw, wsz2, eps=1e-5):
    inner = heads * dim_head
    nwp = tok_ref.shape[1]
    tok = tok_ref[0]                                                     # (nwp, inner) f32

    # Per-head LayerNorm statistics via 0/1 segment matmuls (no slicing/concat).
    ch = lax.broadcasted_iota(jnp.int32, (inner, heads), 0) // dim_head
    hh = lax.broadcasted_iota(jnp.int32, (inner, heads), 1)
    gath = (ch == hh).astype(jnp.float32)                                # (inner, heads)
    ch2 = lax.broadcasted_iota(jnp.int32, (heads, inner), 1) // dim_head
    hh2 = lax.broadcasted_iota(jnp.int32, (heads, inner), 0)
    scat = (ch2 == hh2).astype(jnp.float32)                              # (heads, inner)

    mu = jnp.dot(jnp.dot(tok, gath / dim_head, preferred_element_type=jnp.float32),
                 scat, preferred_element_type=jnp.float32)               # (nwp, inner)
    d = tok - mu
    var = jnp.dot(jnp.dot(d * d, gath / dim_head, preferred_element_type=jnp.float32),
                  scat, preferred_element_type=jnp.float32)
    tn = d * lax.rsqrt(var + eps) * g_ref[...] + b_ref[...]
    tn = jax.nn.gelu(tn, approximate=False)                              # PyTorch erf GELU

    # Single K=inner matmul for the qk projection (softmax scale pre-folded).
    qk = jnp.dot(tn, wqk_ref[...], preferred_element_type=jnp.float32) + bqk_ref[...]

    n_pix = nwp * wsz2
    acc = jnp.zeros((n_pix, o_ref.shape[-1]), jnp.float32)
    for h in range(heads):
        base = 2 * dim_head * h
        wq = qk[:, base: base + dim_head]
        wk = qk[:, base + dim_head: base + 2 * dim_head]
        dots = lax.dot_general(wq, wk, (((1,), (1,)), ((), ())),
                               preferred_element_type=jnp.float32)       # (nwp, nwp), no .T
        if nw < nwp:                                                     # mask zero-padded windows
            col = lax.broadcasted_iota(jnp.int32, dots.shape, 1)
            dots = jnp.where(col < nw, dots, -1e30)
        attn = _softmax_lastdim(dots)
        fm_h = fm_ref[0, h]                                              # (nwp, wsz2*dh) bf16
        agg = jnp.dot(attn.astype(jnp.bfloat16), fm_h,
                      preferred_element_type=jnp.float32)                # bf16 x bf16 -> f32
        agg = agg.reshape(n_pix, dim_head).astype(jnp.bfloat16)          # contiguous merge
        # fused 1x1 output conv: accumulate this head's contribution
        acc = acc + jnp.dot(agg, wo_ref[h], preferred_element_type=jnp.float32)
    o_ref[0] = (acc + bo_ref[...]).astype(o_ref.dtype)


# --------------------------------------------------------------------------
# Generation-aware VMEM budget + window-block selection
# --------------------------------------------------------------------------
def _vmem_limits():
    cap = 64 << 20
    try:
        cap = int(getattr(pltpu.get_tpu_info(), "vmem_capacity_bytes", cap))
    except Exception:
        pass
    limit = int(min(cap * 3 // 4, 112 << 20))     # scoped-VMEM limit to request
    return limit // 2, limit                      # (block budget for kernel A, limit)


def _pick_window_block(nw, n_tok, dim, heads, dim_head, wsz2, budget):
    """Windows per kernel-A grid step: all of nw if it fits, else a multiple of 8
    (nw is then zero-padded up to a multiple of the block)."""
    inner = heads * dim_head

    def cost(t):
        io = 2 * (t * n_tok * dim * 4            # x block (double-buffered)
                  + dim * 3 * inner * 4          # w_qkv block (double-buffered)
                  + t * inner * 4                # tok out block (double-buffered)
                  + t * wsz2 * inner * 2)        # fm out block, bf16 (double-buffered)
        live = (3 * t * n_tok * 3 * inner * 4    # qkv value + relayout copies (not dbl-buffered)
                + 2 * t * n_tok * n_tok * 4      # dots / attn temps
                + 2 * t * wsz2 * inner * 4)      # per-head outputs / fm staging
        return io + live

    if cost(nw) <= budget:
        return nw, nw
    tbw = 8
    while tbw * 2 < nw and cost(tbw * 2) <= budget:
        tbw *= 2
    nwp = -(-nw // tbw) * tbw
    return tbw, nwp


# --------------------------------------------------------------------------
# Wrapper (glue reshapes in plain JAX, hot path in Pallas)
# --------------------------------------------------------------------------
def dssa_forward(x, params, *, heads, dim_head, window_size):
    b, dim, H, W = x.shape
    wsz = window_size
    assert H % wsz == 0 and W % wsz == 0
    X, Y = H // wsz, W // wsz
    nw, wsz2 = X * Y, wsz * wsz
    inner = heads * dim_head
    n_tok = 1 + wsz2
    scale = dim_head ** (-0.5)

    # Fold the softmax scale into the q-producing weight columns (linear projections).
    qcol = jnp.concatenate([jnp.full((inner,), scale, jnp.float32),
                            jnp.ones((2 * inner,), jnp.float32)])
    w_qkv = params['w_qkv'].astype(jnp.float32) * qcol[None, :]
    qk_colscale = jnp.where((jnp.arange(2 * inner) % (2 * dim_head)) < dim_head,
                            scale, 1.0).astype(jnp.float32)
    w_qk = params['w_qk'].astype(jnp.float32) * qk_colscale[None, :]
    b_qk = params['b_qk'].astype(jnp.float32) * qk_colscale

    gamma_t = jnp.tile(params['ln_gamma'].astype(jnp.float32), heads)[None, :]   # (1, inner)
    beta_t = jnp.tile(params['ln_beta'].astype(jnp.float32), heads)[None, :]
    w_out_h = params['w_out'].astype(jnp.float32).reshape(heads, dim_head, dim).astype(jnp.bfloat16)
    b_out = params['b_out'].astype(jnp.float32)[None, :]

    # 'b c (x w1) (y w2) -> b (x y) (w1 w2) c', prepend the learned window token.
    xw = x.astype(jnp.float32).reshape(b, dim, X, wsz, Y, wsz).transpose(0, 2, 4, 3, 5, 1)
    xw = xw.reshape(b, nw, wsz2, dim)
    wtok = jnp.broadcast_to(params['window_tokens'].astype(jnp.float32)[None, None, None, :],
                            (b, nw, 1, dim))
    xw = jnp.concatenate([wtok, xw], axis=2)                             # (b, nw, N, dim)

    budget, vmem_limit = _vmem_limits()
    tbw, nwp = _pick_window_block(nw, n_tok, dim, heads, dim_head, wsz2, budget)
    nwb = nwp // tbw
    if nwp > nw:
        xw = jnp.pad(xw, ((0, 0), (0, nwp - nw), (0, 0), (0, 0)))
    x_blocks = xw.reshape(b, nwb, tbw * n_tok, dim)                      # contiguous reshape

    tok, fm = pl.pallas_call(
        functools.partial(_win_attn_kernel, heads=heads, dim_head=dim_head,
                          n_tok=n_tok, tbw=tbw, wsz2=wsz2),
        out_shape=(jax.ShapeDtypeStruct((b, nwp, inner), jnp.float32),
                   jax.ShapeDtypeStruct((b, heads, nwp, wsz2 * dim_head), jnp.bfloat16)),
        grid=(b, nwb),
        in_specs=[pl.BlockSpec((1, 1, tbw * n_tok, dim), lambda i, j: (i, j, 0, 0)),
                  pl.BlockSpec((dim, 3 * inner), lambda i, j: (0, 0))],
        out_specs=(pl.BlockSpec((1, tbw, inner), lambda i, j: (i, j, 0)),
                   pl.BlockSpec((1, heads, tbw, wsz2 * dim_head), lambda i, j: (i, 0, j, 0))),
        compiler_params=pltpu.CompilerParams(
            dimension_semantics=("parallel", "parallel"),
            vmem_limit_bytes=vmem_limit),
    )(x_blocks, w_qkv)

    # Stage 2 (inter-window attention) fused with the 1x1 output projection.
    # For nw == 1 the inter-window softmax is identically 1, which reproduces the
    # module's num_windows == 1 shortcut, so no special case is needed.
    out_pix = pl.pallas_call(
        functools.partial(_stage2_kernel, heads=heads, dim_head=dim_head,
                          nw=nw, wsz2=wsz2),
        out_shape=jax.ShapeDtypeStruct((b, nwp * wsz2, dim), jnp.float32),
        grid=(b,),
        in_specs=[pl.BlockSpec((1, nwp, inner), lambda i: (i, 0, 0)),
                  pl.BlockSpec((1, heads, nwp, wsz2 * dim_head), lambda i: (i, 0, 0, 0)),
                  pl.BlockSpec((1, inner), lambda i: (0, 0)),
                  pl.BlockSpec((1, inner), lambda i: (0, 0)),
                  pl.BlockSpec((inner, 2 * inner), lambda i: (0, 0)),
                  pl.BlockSpec((1, 2 * inner), lambda i: (0, 0)),
                  pl.BlockSpec((heads, dim_head, dim), lambda i: (0, 0, 0)),
                  pl.BlockSpec((1, dim), lambda i: (0, 0))],
        out_specs=pl.BlockSpec((1, nwp * wsz2, dim), lambda i: (i, 0, 0)),
        compiler_params=pltpu.CompilerParams(
            dimension_semantics=("parallel",),
            vmem_limit_bytes=vmem_limit),
    )(tok, fm, gamma_t, beta_t, w_qk, b_qk[None, :], w_out_h, b_out)
    # TODO(synk): for very large images on v7x (64 MiB VMEM), tile the wsz2*dh lane
    # dimension of fm / the output with an extra grid axis (attn stashed in scratch).

    # 'b (x y w1 w2) d -> b d (x w1) (y w2)'  (drop zero-padded windows if any)
    out = out_pix.reshape(b, nwp, wsz2, dim)[:, :nw]
    out = out.reshape(b, X, Y, wsz, wsz, dim).transpose(0, 5, 1, 3, 2, 4)
    return out.reshape(b, dim, H, W)


# --------------------------------------------------------------------------
# Pure-JAX reference (mirrors the PyTorch forward) for a correctness check
# --------------------------------------------------------------------------
def dssa_reference(x, params, *, heads, dim_head, window_size):
    b, dim, H, W = x.shape
    wsz = window_size
    X, Y = H // wsz, W // wsz
    nw = X * Y
    wsz2 = wsz * wsz
    inner = heads * dim_head
    scale = dim_head ** (-0.5)

    xw = x.reshape(b, dim, X, wsz, Y, wsz).transpose(0, 2, 4, 1, 3, 5).reshape(b * nw, dim, wsz2)
    wt = jnp.broadcast_to(params['window_tokens'][None, :, None], (b * nw, dim, 1))
    xw = jnp.concatenate([wt, xw], axis=-1)                              # (BW, dim, N)
    qkv = jnp.einsum('bcn,co->bno', xw, params['w_qkv'], precision='highest')
    q, k, v = jnp.split(qkv, 3, axis=-1)
    to_heads = lambda t: t.reshape(t.shape[0], t.shape[1], heads, dim_head).transpose(0, 2, 1, 3)
    q, k, v = map(to_heads, (q, k, v))
    q = q * scale
    attn = jax.nn.softmax(jnp.einsum('bhid,bhjd->bhij', q, k, precision='highest'), axis=-1)
    out = jnp.einsum('bhij,bhjd->bhid', attn, v, precision='highest')
    wtok, wfm = out[:, :, 0], out[:, :, 1:]
    if nw == 1:
        fmap = wfm.reshape(b, X, Y, heads, wsz, wsz, dim_head)
        fmap = fmap.transpose(0, 3, 6, 1, 4, 2, 5).reshape(b, inner, H, W)
    else:
        wtok = wtok.reshape(b, nw, heads, dim_head).transpose(0, 2, 1, 3)
        wfm = wfm.reshape(b, nw, heads, wsz2, dim_head).transpose(0, 2, 1, 3, 4)
        mu = wtok.mean(-1, keepdims=True)
        var = ((wtok - mu) ** 2).mean(-1, keepdims=True)
        tn = (wtok - mu) * jax.lax.rsqrt(var + 1e-5) * params['ln_gamma'] + params['ln_beta']
        tn = jax.nn.gelu(tn, approximate=False)
        flat = tn.transpose(0, 2, 1, 3).reshape(b, nw, inner)
        qk2 = jnp.einsum('bnc,co->bno', flat, params['w_qk'], precision='highest') + params['b_qk']
        qk2 = qk2.reshape(b, nw, heads, 2 * dim_head).transpose(0, 2, 1, 3)
        wq, wk = qk2[..., :dim_head] * scale, qk2[..., dim_head:]
        wattn = jax.nn.softmax(jnp.einsum('bhid,bhjd->bhij', wq, wk, precision='highest'), axis=-1)
        aggf = jnp.einsum('bhij,bhjwd->bhiwd', wattn, wfm, precision='highest')
        aggf = aggf.reshape(b, heads, X, Y, wsz, wsz, dim_head)
        fmap = aggf.transpose(0, 1, 6, 2, 4, 3, 5).reshape(b, inner, H, W)
    out = jnp.einsum('bchw,co->bohw', fmap, params['w_out'], precision='highest')
    return out + params['b_out'][None, :, None, None]


if __name__ == "__main__":
    # Small, module-consistent shapes: dim=8, heads=2, dim_head=8, window=4, 8x8 fmap.
    b, dim, H, W = 2, 8, 8, 8
    heads, dim_head, window_size = 2, 8, 4
    inner = heads * dim_head

    key = jax.random.PRNGKey(0)
    ks = jax.random.split(key, 8)
    params = dict(
        window_tokens=jax.random.normal(ks[0], (dim,), jnp.float32),
        w_qkv=jax.random.normal(ks[1], (dim, 3 * inner), jnp.float32) * 0.1,
        ln_gamma=jnp.ones((dim_head,), jnp.float32),        # LayerNorm default init
        ln_beta=jnp.zeros((dim_head,), jnp.float32),
        w_qk=jax.random.normal(ks[2], (inner, 2 * inner), jnp.float32) * 0.1,
        b_qk=jax.random.normal(ks[3], (2 * inner,), jnp.float32) * 0.1,
        w_out=jax.random.normal(ks[4], (inner, dim), jnp.float32) * 0.1,
        b_out=jax.random.normal(ks[5], (dim,), jnp.float32) * 0.1,
    )
    x = jax.random.normal(ks[6], (b, dim, H, W), jnp.float32)

    out = dssa_forward(x, params, heads=heads, dim_head=dim_head, window_size=window_size)
    out = jax.block_until_ready(out)
    assert out.shape == (b, dim, H, W), out.shape

    ref = jax.block_until_ready(
        dssa_reference(x, params, heads=heads, dim_head=dim_head, window_size=window_size))
    assert jnp.allclose(out, ref, atol=2e-2, rtol=2e-2), float(jnp.max(jnp.abs(out - ref)))

    # TODO(synk): dropout layers are identity at p=0.0 and therefore omitted.
    print("KERNEL_OK")
</pallas_src>

<mosaic_0001>
module attributes {stable_mosaic.version = 11 : i64} {
  func.func @_win_attn_kernel(%arg0: i32, %arg1: i32, %arg2: memref<1x1x68x8xf32, #tpu.memory_space<vmem>>, %arg3: memref<8x48xf32, #tpu.memory_space<vmem>>, %arg4: memref<1x4x16xf32, #tpu.memory_space<vmem>>, %arg5: memref<1x2x4x128xbf16, #tpu.memory_space<vmem>>) attributes {dimension_semantics = [#tpu.dimension_semantics<parallel>, #tpu.dimension_semantics<parallel>], iteration_bounds = array<i64: 2, 1>, scalar_prefetch = 0 : i64, scratch_operands = 0 : i64, tpu.core_type = #tpu.core_type<tc>, window_params = [{transform_indices = @transform_0, window_bounds = array<i64: 1, 1, 68, 8>}, {pipeline_mode = #tpu.pipeline_mode<synchronous>, transform_indices = @transform_1, window_bounds = array<i64: 8, 48>}, {transform_indices = @transform_2, window_bounds = array<i64: 1, 4, 16>}, {transform_indices = @transform_3, window_bounds = array<i64: 1, 2, 4, 128>}]} {
    %c0 = arith.constant 0 : index
    %c0_0 = arith.constant 0 : index
    %c0_1 = arith.constant 0 : index
    %c0_2 = arith.constant 0 : index
    %0 = vector.load %arg2[%c0, %c0_0, %c0_1, %c0_2] : memref<1x1x68x8xf32, #tpu.memory_space<vmem>>, vector<1x1x68x8xf32>
    %1 = vector.shape_cast %0 : vector<1x1x68x8xf32> to vector<68x8xf32>
    %c0_3 = arith.constant 0 : index
    %c0_4 = arith.constant 0 : index
    %2 = vector.load %arg3[%c0_3, %c0_4] : memref<8x48xf32, #tpu.memory_space<vmem>>, vector<8x48xf32>
    %cst = arith.constant dense<0.000000e+00> : vector<68x48xf32>
    %3 = tpu.matmul %1, %2, %cst {dimension_numbers = #tpu.dot_dimension_numbers<[1], [0], [0], [1], [0, 0, 1, 1], [], []>} : vector<68x8xf32>, vector<8x48xf32>, vector<68x48xf32> -> vector<68x48xf32>
    %4 = vector.shape_cast %3 : vector<68x48xf32> to vector<4x17x48xf32>
    %5 = vector.extract_strided_slice %4 {offsets = [0, 0, 0], sizes = [4, 17, 8], strides = [1, 1, 1]} : vector<4x17x48xf32> to vector<4x17x8xf32>
    %6 = vector.extract_strided_slice %4 {offsets = [0, 0, 16], sizes = [4, 17, 8], strides = [1, 1, 1]} : vector<4x17x48xf32> to vector<4x17x8xf32>
    %7 = vector.extract_strided_slice %4 {offsets = [0, 0, 32], sizes = [4, 17, 8], strides = [1, 1, 1]} : vector<4x17x48xf32> to vector<4x17x8xf32>
    "tpu.trace_start"() <{level = 10 : i32, message = "tnd,tmd->tnm"}> : () -> ()
    %cst_5 = arith.constant dense<0.000000e+00> : vector<4x17x17xf32>
    %8 = tpu.matmul %5, %6, %cst_5 {dimension_numbers = #tpu.dot_dimension_numbers<[2], [2], [1], [1], [0, 0, 0, 1, 1, 1], [0], [0]>} : vector<4x17x8xf32>, vector<4x17x8xf32>, vector<4x17x17xf32> -> vector<4x17x17xf32>
    "tpu.trace_stop"() : () -> ()
    %cst_6 = arith.constant dense<0xFF800000> : vector<4x17xf32>
    %9 = vector.multi_reduction <maximumf>, %8, %cst_6 [2] : vector<4x17x17xf32> to vector<4x17xf32>
    %10 = vector.shape_cast %9 : vector<4x17xf32> to vector<4x17x1xf32>
    %11 = vector.broadcast %10 : vector<4x17x1xf32> to vector<4x17x17xf32>
    %12 = arith.subf %8, %11 : vector<4x17x17xf32>
    %13 = math.exp %12 : vector<4x17x17xf32>
    %cst_7 = arith.constant dense<0.000000e+00> : vector<4x17xf32>
    %14 = vector.multi_reduction <add>, %13, %cst_7 [2] : vector<4x17x17xf32> to vector<4x17xf32>
    %15 = vector.shape_cast %14 : vector<4x17xf32> to vector<4x17x1xf32>
    %16 = tpu.reciprocal %15 {approx = true} : vector<4x17x1xf32> -> vector<4x17x1xf32>
    %17 = vector.broadcast %16 : vector<4x17x1xf32> to vector<4x17x17xf32>
    %18 = arith.mulf %13, %17 : vector<4x17x17xf32>
    "tpu.trace_start"() <{level = 10 : i32, message = "tnm,tmd->tnd"}> : () -> ()
    %cst_8 = arith.constant dense<0.000000e+00> : vector<4x17x8xf32>
    %19 = tpu.matmul %18, %7, %cst_8 {dimension_numbers = #tpu.dot_dimension_numbers<[2], [1], [1], [2], [0, 0, 0, 1, 1, 2], [0], [0]>} : vector<4x17x17xf32>, vector<4x17x8xf32>, vector<4x17x8xf32> -> vector<4x17x8xf32>
    "tpu.trace_stop"() : () -> ()
    %20 = vector.extract_strided_slice %19 {offsets = [0, 0, 0], sizes = [4, 1, 8], strides = [1, 1, 1]} : vector<4x17x8xf32> to vector<4x1x8xf32>
    %21 = vector.shape_cast %20 : vector<4x1x8xf32> to vector<4x8xf32>
    %c0_9 = arith.constant 0 : index
    %c0_10 = arith.constant 0 : index
    %c0_11 = arith.constant 0 : index
    %22 = vector.load %arg4[%c0_9, %c0_10, %c0_11] : memref<1x4x16xf32, #tpu.memory_space<vmem>>, vector<1x4x8xf32>
    %23 = vector.shape_cast %22 : vector<1x4x8xf32> to vector<4x8xf32>
    %24 = vector.shape_cast %21 : vector<4x8xf32> to vector<1x4x8xf32>
    tpu.vector_store %arg4[%c0_9, %c0_10, %c0_11], %24 {strides = array<i32>} : memref<1x4x16xf32, #tpu.memory_space<vmem>>, vector<1x4x8xf32>,
    %25 = vector.extract_strided_slice %19 {offsets = [0, 1, 0], sizes = [4, 16, 8], strides = [1, 1, 1]} : vector<4x17x8xf32> to vector<4x16x8xf32>
    %26 = vector.shape_cast %25 : vector<4x16x8xf32> to vector<4x128xf32>
    %27 = arith.truncf %26 : vector<4x128xf32> to vector<4x128xbf16>
    %c0_12 = arith.constant 0 : index
    %c0_13 = arith.constant 0 : index
    %c0_14 = arith.constant 0 : index
    %c0_15 = arith.constant 0 : index
    %28 = vector.load %arg5[%c0_12, %c0_13, %c0_14, %c0_15] : memref<1x2x4x128xbf16, #tpu.memory_space<vmem>>, vector<1x1x4x128xbf16>
    %29 = vector.shape_cast %28 : vector<1x1x4x128xbf16> to vector<4x128xbf16>
    %30 = vector.shape_cast %27 : vector<4x128xbf16> to vector<1x1x4x128xbf16>
    tpu.vector_store %arg5[%c0_12, %c0_13, %c0_14, %c0_15], %30 {strides = array<i32>} : memref<1x2x4x128xbf16, #tpu.memory_space<vmem>>, vector<1x1x4x128xbf16>,
    %31 = vector.extract_strided_slice %4 {offsets = [0, 0, 8], sizes = [4, 17, 8], strides = [1, 1, 1]} : vector<4x17x48xf32> to vector<4x17x8xf32>
    %32 = vector.extract_strided_slice %4 {offsets = [0, 0, 24], sizes = [4, 17, 8], strides = [1, 1, 1]} : vector<4x17x48xf32> to vector<4x17x8xf32>
    %33 = vector.extract_strided_slice %4 {offsets = [0, 0, 40], sizes = [4, 17, 8], strides = [1, 1, 1]} : vector<4x17x48xf32> to vector<4x17x8xf32>
    "tpu.trace_start"() <{level = 10 : i32, message = "tnd,tmd->tnm"}> : () -> ()
    %cst_16 = arith.constant dense<0.000000e+00> : vector<4x17x17xf32>
    %34 = tpu.matmul %31, %32, %cst_16 {dimension_numbers = #tpu.dot_dimension_numbers<[2], [2], [1], [1], [0, 0, 0, 1, 1, 1], [0], [0]>} : vector<4x17x8xf32>, vector<4x17x8xf32>, vector<4x17x17xf32> -> vector<4x17x17xf32>
    "tpu.trace_stop"() : () -> ()
    %cst_17 = arith.constant dense<0xFF800000> : vector<4x17xf32>
    %35 = vector.multi_reduction <maximumf>, %34, %cst_17 [2] : vector<4x17x17xf32> to vector<4x17xf32>
    %36 = vector.shape_cast %35 : vector<4x17xf32> to vector<4x17x1xf32>
    %37 = vector.broadcast %36 : vector<4x17x1xf32> to vector<4x17x17xf32>
    %38 = arith.subf %34, %37 : vector<4x17x17xf32>
    %39 = math.exp %38 : vector<4x17x17xf32>
    %cst_18 = arith.constant dense<0.000000e+00> : vector<4x17xf32>
    %40 = vector.multi_reduction <add>, %39, %cst_18 [2] : vector<4x17x17xf32> to vector<4x17xf32>
    %41 = vector.shape_cast %40 : vector<4x17xf32> to vector<4x17x1xf32>
    %42 = tpu.reciprocal %41 {approx = true} : vector<4x17x1xf32> -> vector<4x17x1xf32>
    %43 = vector.broadcast %42 : vector<4x17x1xf32> to vector<4x17x17xf32>
    %44 = arith.mulf %39, %43 : vector<4x17x17xf32>
    "tpu.trace_start"() <{level = 10 : i32, message = "tnm,tmd->tnd"}> : () -> ()
    %cst_19 = arith.constant dense<0.000000e+00> : vector<4x17x8xf32>
    %45 = tpu.matmul %44, %33, %cst_19 {dimension_numbers = #tpu.dot_dimension_numbers<[2], [1], [1], [2], [0, 0, 0, 1, 1, 2], [0], [0]>} : vector<4x17x17xf32>, vector<4x17x8xf32>, vector<4x17x8xf32> -> vector<4x17x8xf32>
    "tpu.trace_stop"() : () -> ()
    %46 = vector.extract_strided_slice %45 {offsets = [0, 0, 0], sizes = [4, 1, 8], strides = [1, 1, 1]} : vector<4x17x8xf32> to vector<4x1x8xf32>
    %47 = vector.shape_cast %46 : vector<4x1x8xf32> to vector<4x8xf32>
    %c0_20 = arith.constant 0 : index
    %c0_21 = arith.constant 0 : index
    %c8 = arith.constant 8 : index
    %48 = vector.load %arg4[%c0_20, %c0_21, %c8] : memref<1x4x16xf32, #tpu.memory_space<vmem>>, vector<1x4x8xf32>
    %49 = vector.shape_cast %48 : vector<1x4x8xf32> to vector<4x8xf32>
    %50 = vector.shape_cast %47 : vector<4x8xf32> to vector<1x4x8xf32>
    tpu.vector_store %arg4[%c0_20, %c0_21, %c8], %50 {strides = array<i32>} : memref<1x4x16xf32, #tpu.memory_space<vmem>>, vector<1x4x8xf32>,
    %51 = vector.extract_strided_slice %45 {offsets = [0, 1, 0], sizes = [4, 16, 8], strides = [1, 1, 1]} : vector<4x17x8xf32> to vector<4x16x8xf32>
    %52 = vector.shape_cast %51 : vector<4x16x8xf32> to vector<4x128xf32>
    %53 = arith.truncf %52 : vector<4x128xf32> to vector<4x128xbf16>
    %c0_22 = arith.constant 0 : index
    %c1 = arith.constant 1 : index
    %c0_23 = arith.constant 0 : index
    %c0_24 = arith.constant 0 : index
    %54 = vector.load %arg5[%c0_22, %c1, %c0_23, %c0_24] : memref<1x2x4x128xbf16, #tpu.memory_space<vmem>>, vector<1x1x4x128xbf16>
    %55 = vector.shape_cast %54 : vector<1x1x4x128xbf16> to vector<4x128xbf16>
    %56 = vector.shape_cast %53 : vector<4x128xbf16> to vector<1x1x4x128xbf16>
    tpu.vector_store %arg5[%c0_22, %c1, %c0_23, %c0_24], %56 {strides = array<i32>} : memref<1x2x4x128xbf16, #tpu.memory_space<vmem>>, vector<1x1x4x128xbf16>,
    return
  }
  func.func @transform_0(%arg0: i32, %arg1: i32) -> (i32, i32, i32, i32) {
    %c0_i32 = arith.constant 0 : i32
    %c0_i32_0 = arith.constant 0 : i32
    %c0_i32_1 = arith.constant 0 : i32
    return %arg0, %arg1, %c0_i32, %c0_i32_0 : i32, i32, i32, i32
  }
  func.func @transform_1(%arg0: i32, %arg1: i32) -> (i32, i32) {
    %c0_i32 = arith.constant 0 : i32
    %c0_i32_0 = arith.constant 0 : i32
    %c0_i32_1 = arith.constant 0 : i32
    return %c0_i32, %c0_i32_0 : i32, i32
  }
  func.func @transform_2(%arg0: i32, %arg1: i32) -> (i32, i32, i32) {
    %c0_i32 = arith.constant 0 : i32
    %c0_i32_0 = arith.constant 0 : i32
    return %arg0, %arg1, %c0_i32 : i32, i32, i32
  }
  func.func @transform_3(%arg0: i32, %arg1: i32) -> (i32, i32, i32, i32) {
    %c0_i32 = arith.constant 0 : i32
    %c0_i32_0 = arith.constant 0 : i32
    %c0_i32_1 = arith.constant 0 : i32
    return %arg0, %c0_i32, %arg1, %c0_i32_0 : i32, i32, i32, i32
  }
}

</mosaic_0001>

<bundles_post_ra>
// kernel: tpu_custom_call.1
= control target key start
LH: loop header
LB: loop body
LE: loop exit
PB: predicated region body
PF: predicated region fallthrough
CT: control target
= control target key end

     0   :  { %9 = vsyncpa [#allocation3], 0  ;;  %s5862_s0 = inlined_call_operand.vmem [shape: f32[2,1,68,8], index: 0, kind: input, shape index: {}]   ;;  %s5863_s1 = inlined_call_operand.vmem [shape: f32[8,48], index: 1, kind: input, shape index: {}]   ;;  %s5864_s2 = inlined_call_operand.hbm [shape: f32[2,4,16], index: 2, kind: output, shape index: {0}]   ;;  %s5865_s3 = inlined_call_operand.hbm [shape: bf16[2,2,4,128], index: 3, kind: output, shape index: {1}]  }
   0x1   :  { %11 = vsyncpa [#allocation3 + $0x1], 0 }
   0x2   :  { %12 = vsyncpa [#allocation5], 0 }
   0x3   :  { %14 = vsyncpa [#allocation5 + $0x1], 0  ;;  %s4684_s12 = smov 0   ;;  %s4686_s13 = smov 0  }
   0x4   :  { %s4688_s14 = smov 0   ;;  %s4690_s15 = smov 0  }
   0x5   :  { %s4692_s16 = smov 0   ;;  %s4694_s17 = smov 0  }
   0x6 LB: > { %s3791_s18 = sadd.s32 4294967295, %s4639_s17   ;;  %s3792_s19 = sadd.s32 4294967294, %s4639_s17   ;;  %s4639_s17 = sphi %s4694_s17, %s20_s17   ;;  %s4635_s16 = sphi %s4692_s16, %s5872_s16   ;;  %s4631_s15 = sphi %s4690_s15, %s5871_s15   ;;  %s4627_s14 = sphi %s4688_s14, %s5870_s14   ;;  %s4623_s13 = sphi %s4686_s13, %s5869_s13   ;;  %s4619_s12 = sphi %s4684_s12, %s5868_s12  }
   0x7   : > { %s32_s20 = sadd.s32 1, %s4635_s16  ;;  %s90_s21 = sadd.s32 1, %s4627_s14 }
   0x8   : > { %p34_p0 = scmp.ge.s32.totalorder %s32_s20, 2  ;;  %p100_p1 = scmp.ne.s32.totalorder %s4627_s14, %s4623_s13 }
   0x9   : > { %p101_p2 = scmp.eq.s32.totalorder %s3791_s18, 1  ;;  %p106_p3 = scmp.ne.s32.totalorder %s4623_s13, %s4619_s12 }
   0xa   : > { %s5874_s20 = smov (%p34_p0, %s32_s20), 0  ;;  %p107_p5 = scmp.eq.s32.totalorder %s3792_s19, 1 }
   0xb   : > { %p4724_p4 = por %p101_p2, %p100_p1  ;;  %s85_s23 = ssub.s32 %s4635_s16, %s5874_s20 }
   0xc   : > { %p3795_p6 = scmp.ge.s32.totalorder %s4639_s17, 1  ;;  %p88_p7 = scmp.eq.s32.totalorder %s85_s23, 0 }
   0xd   : > { %p4731_p8 = por %p107_p5, %p106_p3  ;;  %p168_p9 = scmp.lt.s32.totalorder %s4639_s17, 3 }
   0xe   : > { %s4737_s25 = scalar_select %p88_p7, %s4627_s14, %s90_s21  }
   0xf   : > { %p169_p10 = pnand %p3795_p6, %p168_p9 }
  0x10   : > { %p201_p11 = scmp.lt.s32.totalorder (!%p169_p10), %s4631_s15, 1  ;;  %s4644_s6 = smov (!%p169_p10), 112  }
  0x11   : > { %172 = sbr.rel (%p169_p10) target bundleno = 1876 (0x754), region = 28  ;;  %s4645_s7 = smov (!%p169_p10), 96  }
  0x12   : > { %s4646_s8 = smov (!%p169_p10), 104   ;;  %s4647_s9 = smov (!%p169_p10), 120  }
  0x13   : > { %s4648_s10 = smov (!%p169_p10), 88   ;;  %s5415_s11 = sand.u32 (!%p169_p10), 1, %s4623_s13  }
  0x14   : > { %s3796_s18 = sshll.u32 (!%p169_p10), %s5415_s11, 2  ;;  %s4651_s21 = smov (!%p169_p10), 16  }
  0x15   : > { %s5434_s19 = scalar_lea.vmem (!%p169_p10), [#allocation2], %s3796_s18  ;;  %s4652_s23 = smov (!%p169_p10), 8  }
  0x16   : > { %v219_v0 = vld [vmem:[%s5863_s1] sm:$0xff]  ;;  %v4641_v1 = vmov 0.0   ;;  %vm4642_vm0 = vmmov 0   ;;  %s202_s28 = scalar_select %p201_p11, %s4631_s15, 1  ;;  %vm220_vm1 = vcmask 64512   ;;  %v371_v13 = vlaneseq }
  0x17   : > { %4011 = vmatprep.subr.mxu0 %v4641_v1  ;;  %4013 = vmatprep.mubr.msk.f32.mxu0 %vm4642_vm0, %v4641_v1  ;;  %v4643_v11 = vmov 1966171168   ;;  %vm1774_vm2 = vcmask 1040384   ;;  %vm1623_vm3 = vcmask 138240   ;;  %vm1630_vm4 = vcmask 131072   ;;  %s4653_s26 = smov 32  }
  0x18   : > { %4012 = vmatpush3.msra.mxu0 %v219_v0  ;;  %4040 = vmatprep.subr.mxu1 %v4641_v1  ;;  %s4280_s29 = smul.u32 72, %s202_s28  ;;  %v369_v12 = vunpack.c.l.s4 %v4643_v11  ;;  %v4781_v15 = vshrl.u32 %v371_v13, 7  ;;  %vm2178_vm5 = vcmask 1046528   ;;  %vm2159_vm6 = vcmask 1041409   ;;  %s4654_s27 = smov 24  }
  0x19   : > { %4046 = vmatprep.mubr.msk.f32.mxu1 %vm4642_vm0, %v4641_v1  ;;  %4085 = vmatprep.subr.mxu0 %v4641_v1  ;;  %vm2162_vm7 = vcmask 1042434   ;;  %vm2165_vm8 = vcmask 1043459   ;;  %vm2168_vm9 = vcmask 60416   ;;  %s4655_s28 = smov 48   ;;  %s4657_s30 = smov 64   ;;  %vm2404_vm10 = vcmask 130048  }
  0x1a   : > { %s209_s5 = scalar_lea.vmem %s5862_s0, %s4280_s29  ;;  %v370_v14 = vunpack.c.0.s8 %v369_v12  ;;  %s4656_s29 = smov 40   ;;  %vm2406_vm11 = vcmask 195584   ;;  %vm2408_vm12 = vcmask 261120   ;;  %vm2410_vm13 = vcmask 326656  }
  0x1b   : > { %v210_v2 = vld [vmem:[%s209_s5] sm:$0xff]  ;;  %v211_v3 = vld [vmem:[%s209_s5 + $0x8] sm:$0xff]  ;;  %v212_v4 = vld [vmem:[%s209_s5 + $0x10] sm:$0xff]  ;;  %s4658_s4 = smov 56   ;;  %vm2412_vm14 = vcmask 392192   ;;  %vm2414_vm15 = vcmask 457728  }
  0x1c   : > { %4014 = vmatmul.mubr.msk.f32.vlgmr.msra.gmra.mxu0 %vm220_vm1, %v210_v2  ;;  %v213_v5 = vld [vmem:[%s209_s5 + $0x18] sm:$0xff]  ;;  %v214_v6 = vld [vmem:[%s209_s5 + $0x20] sm:$0xff]  ;;  %v215_v7 = vld [vmem:[%s209_s5 + $0x28] sm:$0xff]  ;;  %v4784_v16 = vsub.s32 %v370_v14, %v4781_v15 }
  0x1d   : > { %4016 = vmatprep.mubr.msk.f32.mxu0 %vm4642_vm0, %v4641_v1  ;;  %v216_v8 = vld [vmem:[%s209_s5 + $0x30] sm:$0xff]  ;;  %v217_v9 = vld [vmem:[%s209_s5 + $0x38] sm:$0xff]  ;;  %v218_v10 = vld [vmem:[%s209_s5 + $0x40] sm:$0xf]  ;;  %s4659_s5 = smov 80  }
  0x20   : > { %4017 = vmatmul.mubr.msk.f32.gmra.mxu0 %vm220_vm1, %v211_v3 }
  0x21   : > { %4019 = vmatprep.mubr.msk.f32.mxu0 %vm4642_vm0, %v4641_v1 }
  0x24   : > { %4020 = vmatmul.mubr.msk.f32.gmra.mxu0 %vm220_vm1, %v212_v4 }
  0x25   : > { %4022 = vmatprep.mubr.msk.f32.mxu0 %vm4642_vm0, %v4641_v1 }
  0x28   : > { %4023 = vmatmul.mubr.msk.f32.gmra.mxu0 %vm220_vm1, %v213_v5 }
  0x29   : > { %4025 = vmatprep.mubr.msk.f32.mxu0 %vm4642_vm0, %v4641_v1 }
  0x2c   : > { %4026 = vmatmul.mubr.msk.f32.gmra.mxu0 %vm220_vm1, %v214_v6 }
  0x2d   : > { %4028 = vmatprep.mubr.msk.f32.mxu0 %vm4642_vm0, %v4641_v1 }
  0x30   : > { %4029 = vmatmul.mubr.msk.f32.gmra.mxu0 %vm220_vm1, %v215_v7 }
  0x31   : > { %4031 = vmatprep.mubr.msk.f32.mxu0 %vm4642_vm0, %v4641_v1 }
  0x34   : > { %4032 = vmatmul.mubr.msk.f32.gmra.mxu0 %vm220_vm1, %v216_v8 }
  0x35   : > { %4034 = vmatprep.mubr.msk.f32.mxu0 %vm4642_vm0, %v4641_v1 }
  0x38   : > { %4035 = vmatmul.mubr.msk.f32.gmra.mxu0 %vm220_vm1, %v217_v9 }
  0x39   : > { %4037 = vmatprep.mubr.msk.f32.mxu0 %vm4642_vm0, %v4641_v1 }
  0x3c   : > { %4038 = vmatmul.mubr.msk.f32.gmra.mxu0 %vm220_vm1, %v218_v10 }
  0x3d   : > { %4091 = vmatprep.mubr.msk.f32.mxu0 %vm4642_vm0, %v4641_v1 }
  0xdc   : > { %v314_v17 = vpop.f32.mrf.mxu0 }
  0xdd   : > { %v367_v18 = vcombine.high %v314_v17, %v314_v17  ;;  %v374_v19 = vrot.slane %v314_v17, %v4784_v16 }
  0xde   : > { %v4015_v20 = vpop.f32.mrf.mxu0 }
  0xdf   : > { %v381_v21 = vrot.slane %v367_v18, %v4784_v16  ;;  %v382_v22 = vcombine.high %v374_v19, %v374_v19  ;;  %v390_v25 = vrot.slane %v374_v19, %v4784_v16 }
  0xe0   : > { %v319_v23 = vpop.f32.mrf.mxu0 }
  0xe1   : > { %v383_v24 = vcombine.high %v381_v21, %v381_v21  ;;  %v404_v26 = vrot.slane %v382_v22, %v4784_v16  ;;  %v416_v27 = vcombine.high %v319_v23, %v319_v23  ;;  %v397_v28 = vrot.slane %v381_v21, %v4784_v16 }
  0xe2   : > { %v423_v29 = vrot.slane %v319_v23, %v4784_v16  ;;  %v4018_v30 = vpop.f32.mrf.mxu0 }
  0xe3   : > { %v411_v31 = vrot.slane %v383_v24, %v4784_v16  ;;  %v783_v32 = vcombine.low %v390_v25, %v404_v26  ;;  %v3808_v33 = vcombine.high %v390_v25, %v404_v26  ;;  %v430_v34 = vrot.slane %v416_v27, %v4784_v16 }
  0xe4   : > { %v431_v35 = vcombine.high %v423_v29, %v423_v29  ;;  %v439_v36 = vrot.slane %v423_v29, %v4784_v16  ;;  %v324_v37 = vpop.f32.mrf.mxu0 }
  0xe5   : > { %v785_v38 = vcombine.low %v397_v28, %v411_v31  ;;  %v3809_v39 = vcombine.high %v397_v28, %v411_v31  ;;  %v793_v40 = vrot.slane %v783_v32, %v4784_v16  ;;  %v800_v41 = vrot.slane %v3808_v33, %v4784_v16 }
  0xe6   : > { %v432_v42 = vcombine.high %v430_v34, %v430_v34  ;;  %v446_v43 = vrot.slane %v430_v34, %v4784_v16  ;;  %v453_v44 = vrot.slane %v431_v35, %v4784_v16  ;;  %v465_v45 = vcombine.high %v324_v37, %v324_v37  ;;  %v4021_v46 = vpop.f32.mrf.mxu0 }
  0xe7   : > { %v807_v47 = vrot.slane %v785_v38, %v4784_v16  ;;  %v814_v48 = vrot.slane %v3809_v39, %v4784_v16  ;;  %v815_v49 = vcombine.low %v793_v40, %v800_v41  ;;  %v472_v50 = vrot.slane %v324_v37, %v4784_v16 }
  0xe8   : > { %v460_v51 = vrot.slane %v432_v42, %v4784_v16  ;;  %v832_v52 = vcombine.low %v439_v36, %v453_v44  ;;  %v3810_v53 = vcombine.high %v439_v36, %v453_v44  ;;  %v479_v54 = vrot.slane %v465_v45, %v4784_v16  ;;  %v329_v55 = vpop.f32.mrf.mxu0 }
  0xe9   : > { %v816_v56 = vcombine.low %v807_v47, %v814_v48  ;;  %v823_v57 = vrot.slane %v815_v49, %v4784_v16  ;;  %v480_v58 = vcombine.high %v472_v50, %v472_v50  ;;  %v488_v59 = vrot.slane %v472_v50, %v4784_v16 }
  0xea   : > { %v834_v60 = vcombine.low %v446_v43, %v460_v51  ;;  %v3811_v61 = vcombine.high %v446_v43, %v460_v51  ;;  %v842_v62 = vrot.slane %v832_v52, %v4784_v16  ;;  %v849_v63 = vrot.slane %v3810_v53, %v4784_v16  ;;  %v4024_v0 = vpop.f32.mrf.mxu0 }
  0xeb   : > { %v830_v2 = vrot.slane %v816_v56, %v4784_v16  ;;  %v481_v3 = vcombine.high %v479_v54, %v479_v54  ;;  %v495_v4 = vrot.slane %v479_v54, %v4784_v16  ;;  %v502_v5 = vrot.slane %v480_v58, %v4784_v16 }
  0xec   : > { %v856_v6 = vrot.slane %v834_v60, %v4784_v16  ;;  %v863_v7 = vrot.slane %v3811_v61, %v4784_v16  ;;  %v864_v8 = vcombine.low %v842_v62, %v849_v63  ;;  %v510_v9 = vcombine.high %v488_v59, %v488_v59  ;;  %v334_v10 = vpop.f32.mrf.mxu0 }
  0xed   : > { %v4813_v11 = vcombine.low %v823_v57, %v830_v2  ;;  %v509_v12 = vrot.slane %v481_v3, %v4784_v16  ;;  %v511_v13 = vcombine.high %v495_v4, %v495_v4  ;;  %v512_v14 = vcombine.high %v502_v5, %v502_v5 }
  0xee   : > { %v865_v17 = vcombine.low %v856_v6, %v863_v7  ;;  %v887_v18 = vrot.slane %v488_v59, %v4784_v16  ;;  %v993_v19 = vcombine.low %v502_v5, %v510_v9  ;;  %v4027_v20 = vpop.f32.mrf.mxu0  ;;  %v872_v21 = vrot.slane %v864_v8, %v4784_v16 }
  0xef   : > { %v994_v22 = vcombine.low %v512_v14, %v495_v4  ;;  %v995_v23 = vcombine.low %v509_v12, %v511_v13  ;;  %v514_v24 = vcombine.high %v329_v55, %v329_v55  ;;  %895 = vrot.lane.b32.xlu1 %v4813_v11, %s4644_s6  ;;  %v513_v27 = vcombine.high %v509_v12, %v509_v12 }
  0xf0   : > { %v879_v25 = vrot.slane %v865_v17, %v4784_v16  ;;  %v4822_v26 = vrot.slane %v887_v18, %v4784_v16  ;;  %v521_v28 = vrot.slane %v329_v55, %v4784_v16  ;;  %v339_v29 = vpop.f32.mrf.mxu0  ;;  %v1003_v30 = vrot.slane %v993_v19, %v4784_v16 }
  0xf1   : > { %v1010_v31 = vrot.slane %v994_v22, %v4784_v16  ;;  %v528_v32 = vrot.slane %v514_v24, %v4784_v16  ;;  %v563_v33 = vcombine.high %v334_v10, %v334_v10  ;;  %v570_v37 = vrot.slane %v334_v10, %v4784_v16 }
  0xf2   : > { %v4828_v34 = vcombine.low %v872_v21, %v879_v25  ;;  %v529_v35 = vcombine.high %v521_v28, %v521_v28  ;;  %v537_v36 = vrot.slane %v521_v28, %v4784_v16  ;;  %899 = vrot.lane.b32.xlu0 %v4822_v26, %s4644_s6  ;;  %v4030_v38 = vpop.f32.mrf.mxu0  ;;  %v1017_v41 = vrot.slane %v995_v23, %v4784_v16 }
  0xf3   : > { %v530_v39 = vcombine.high %v528_v32, %v528_v32  ;;  %v544_v40 = vrot.slane %v528_v32, %v4784_v16  ;;  %v577_v42 = vrot.slane %v563_v33, %v4784_v16  ;;  %v578_v46 = vcombine.high %v570_v37, %v570_v37 }
  0xf4   : > { %v551_v43 = vrot.slane %v529_v35, %v4784_v16  ;;  %v559_v44 = vcombine.high %v537_v36, %v537_v36  ;;  %v996_v45 = vcombine.low %v513_v27, %v537_v36  ;;  %v344_v47 = vpop.f32.mrf.mxu0  ;;  %v586_v54 = vrot.slane %v570_v37, %v4784_v16 }
  0xf5   : > { %v558_v48 = vrot.slane %v530_v39, %v4784_v16  ;;  %v560_v49 = vcombine.high %v544_v40, %v544_v40  ;;  %v579_v50 = vcombine.high %v577_v42, %v577_v42  ;;  %v600_v58 = vrot.slane %v578_v46, %v4784_v16 }
  0xf6   : > { %v561_v51 = vcombine.high %v551_v43, %v551_v43  ;;  %v1024_v52 = vrot.slane %v996_v45, %v4784_v16  ;;  %v1042_v53 = vcombine.low %v551_v43, %v559_v44  ;;  %897 = vrot.lane.b32.xlu0 %v4828_v34, %s4644_s6  ;;  %v4033_v55 = vpop.f32.mrf.mxu0  ;;  %v1025_v59 = vcombine.low %v1003_v30, %v1010_v31 }
  0xf7   : > { %v1044_v56 = vcombine.low %v558_v48, %v560_v49  ;;  %v562_v57 = vcombine.high %v558_v48, %v558_v48  ;;  %v1097_v3 = vrot.slane %v600_v58, %v4784_v16  ;;  %v593_v6 = vrot.slane %v577_v42, %v4784_v16 }
  0xf8   : > { %v1026_v60 = vcombine.low %v1017_v41, %v1024_v52  ;;  %v1043_v61 = vcombine.low %v561_v51, %v544_v40  ;;  %v1052_v62 = vrot.slane %v1042_v53, %v4784_v16  ;;  %v349_v63 = vpop.f32.mrf.mxu0  ;;  %v607_v7 = vrot.slane %v579_v50, %v4784_v16 }
  0xf9   : > { %v1045_v0 = vcombine.low %v562_v57, %v586_v54  ;;  %v1066_v2 = vrot.slane %v1044_v56, %v4784_v16  ;;  %v4853_v10 = vrot.slane %v1097_v3, %v4784_v16  ;;  %v612_v12 = vcombine.high %v339_v29, %v339_v29 }
  0xfa   : > { %v1040_v4 = vrot.slane %v1026_v60, %v4784_v16  ;;  %v1059_v5 = vrot.slane %v1043_v61, %v4784_v16  ;;  %v4036_v8 = vpop.f32.mrf.mxu0  ;;  %v1033_v13 = vrot.slane %v1025_v59, %v4784_v16  ;;  %v3824_v17 = vcombine.high %v586_v54, %v600_v58 }
  0xfb   : > { %v1073_v9 = vrot.slane %v1045_v0, %v4784_v16  ;;  %v619_v20 = vrot.slane %v339_v29, %v4784_v16  ;;  %v626_v21 = vrot.slane %v612_v12, %v4784_v16  ;;  %v661_v22 = vcombine.high %v344_v47, %v344_v47  ;;  %1109 = vrot.lane.b32.xlu1 %v4853_v10, %s4644_s6 }
  0xfc   : > { %v1074_v14 = vcombine.low %v1052_v62, %v1059_v5  ;;  %v4856_v18 = vpop.f32.mrf.mxu0  ;;  %v4862_v23 = vcombine.low %v1033_v13, %v1040_v4  ;;  %v1204_v25 = vcombine.low %v593_v6, %v607_v7  ;;  %v668_v27 = vrot.slane %v344_v47, %v4784_v16 }
  0xfd   : > { %v1075_v19 = vcombine.low %v1066_v2, %v1073_v9  ;;  %v627_v31 = vcombine.high %v619_v20, %v619_v20  ;;  %v628_v32 = vcombine.high %v626_v21, %v626_v21  ;;  %v635_v29 = vrot.slane %v619_v20, %v4784_v16 }
  0xfe   : > { %v1082_v24 = vrot.slane %v1074_v14, %v4784_v16  ;;  %v4039_v28 = vpop.f32.mrf.mxu0  ;;  %v3825_v33 = vcombine.high %v593_v6, %v607_v7  ;;  %v642_v35 = vrot.slane %v626_v21, %v4784_v16  ;;  %v675_v36 = vrot.slane %v661_v22, %v4784_v16 }
  0xff   : > { %v1089_v30 = vrot.slane %v1075_v19, %v4784_v16  ;;  %v676_v37 = vcombine.high %v668_v27, %v668_v27  ;;  %v649_v39 = vrot.slane %v627_v31, %v4784_v16  ;;  %v656_v40 = vrot.slane %v628_v32, %v4784_v16  ;;  %1105 = vrot.lane.b32.xlu1 %v4862_v23, %s4644_s6 }
 0x100   : > { %v684_v41 = vrot.slane %v668_v27, %v4784_v16  ;;  %v1213_v42 = vrot.slane %v3824_v17, %v4784_v16  ;;  %v1220_v43 = vrot.slane %v1204_v25, %v4784_v16  ;;  %v677_v44 = vcombine.high %v675_v36, %v675_v36 }
 0x101   : > { %v4870_v38 = vcombine.low %v1082_v24, %v1089_v30  ;;  %v698_v45 = vrot.slane %v676_v37, %v4784_v16  ;;  %v1206_v46 = vcombine.low %v635_v29, %v649_v39  ;;  %v3826_v47 = vcombine.high %v635_v29, %v649_v39 }
 0x102   : > { %v1253_v48 = vcombine.low %v642_v35, %v656_v40  ;;  %v710_v49 = vcombine.high %v349_v63, %v349_v63  ;;  %v1227_v50 = vrot.slane %v3825_v33, %v4784_v16  ;;  %v3827_v51 = vcombine.high %v642_v35, %v656_v40 }
 0x103   : > { %1107 = vrot.lane.b32.xlu0 %v4870_v38, %s4644_s6  ;;  %v691_v52 = vrot.slane %v675_v36, %v4784_v16  ;;  %v706_v53 = vcombine.high %v684_v41, %v684_v41  ;;  %v1234_v54 = vrot.slane %v1206_v46, %v4784_v16  ;;  %v705_v56 = vrot.slane %v677_v44, %v4784_v16 }
 0x104   : > { %v1269_v55 = vrot.slane %v1253_v48, %v4784_v16  ;;  %v717_v57 = vrot.slane %v349_v63, %v4784_v16  ;;  %v1262_v58 = vrot.slane %v3826_v47, %v4784_v16  ;;  %v1255_v59 = vcombine.low %v684_v41, %v698_v45 }
 0x105   : > { %v1307_v60 = vrot.slane %v706_v53, %v4784_v16  ;;  %v1235_v61 = vcombine.low %v1213_v42, %v1220_v43  ;;  %v1236_v62 = vcombine.low %v1227_v50, %v1234_v54  ;;  %v724_v0 = vrot.slane %v710_v49, %v4784_v16 }
 0x106   : > { %v1276_v2 = vrot.slane %v3827_v51, %v4784_v16  ;;  %v1284_v3 = vcombine.low %v1262_v58, %v1269_v55  ;;  %v1283_v4 = vrot.slane %v1255_v59, %v4784_v16  ;;  %v707_v6 = vcombine.high %v691_v52, %v691_v52 }
 0x107   : > { %v4894_v5 = vrot.slane %v1307_v60, %v4784_v16  ;;  %v709_v7 = vcombine.high %v705_v56, %v705_v56  ;;  %v725_v63 = vcombine.high %v717_v57, %v717_v57  ;;  %v726_v8 = vcombine.high %v724_v0, %v724_v0 }
 0x108   : > { %v708_v9 = vcombine.high %v698_v45, %v698_v45  ;;  %v1285_v12 = vcombine.low %v1276_v2, %v1283_v4  ;;  %v733_v13 = vrot.slane %v717_v57, %v4784_v16  ;;  %v740_v14 = vrot.slane %v724_v0, %v4784_v16 }
 0x109   : > { %1319 = vrot.lane.b32.xlu0 %v4894_v5, %s4644_s6  ;;  %v1250_v17 = vrot.slane %v1236_v62, %v4784_v16  ;;  %v747_v19 = vrot.slane %v725_v63, %v4784_v16  ;;  %v754_v20 = vrot.slane %v726_v8, %v4784_v16  ;;  %v765_v21 = vrot.slane %v4856_v18, %v4784_v16 }
 0x10a   : > { %v1292_v22 = vrot.slane %v1284_v3, %v4784_v16  ;;  %v1299_v24 = vrot.slane %v1285_v12, %v4784_v16  ;;  %v755_v25 = vcombine.high %v733_v13, %v733_v13  ;;  %v756_v27 = vcombine.high %v740_v14, %v740_v14 }
 0x10b   : > { %v757_v28 = vcombine.high %v747_v19, %v747_v19  ;;  %v1415_v30 = vcombine.low %v709_v7, %v733_v13  ;;  %v758_v31 = vcombine.high %v754_v20, %v754_v20  ;;  %v766_v32 = vcombine.high %v765_v21, %v765_v21 }
 0x10c   : > { %v4907_v29 = vcombine.low %v1292_v22, %v1299_v24  ;;  %v1416_v33 = vcombine.low %v747_v19, %v755_v25  ;;  %v1463_v35 = vcombine.low %v754_v20, %v756_v27  ;;  %v773_v36 = vrot.slane %v765_v21, %v4784_v16 }
 0x10d   : > { %v1243_v37 = vrot.slane %v1235_v61, %v4784_v16  ;;  %v1413_v39 = vcombine.low %v708_v9, %v691_v52  ;;  %v1462_v18 = vcombine.low %v757_v28, %v740_v14  ;;  %v780_v40 = vrot.slane %v766_v32, %v4784_v16 }
 0x10e   : > { %v1414_v41 = vcombine.low %v705_v56, %v707_v6  ;;  %v1479_v42 = vrot.slane %v1463_v35, %v4784_v16  ;;  %v781_v43 = vcombine.high %v773_v36, %v773_v36  ;;  %v1464_v44 = vcombine.low %v758_v31, %v773_v36  ;;  %1317 = vrot.lane.b32.xlu0 %v4907_v29, %s4644_s6 }
 0x10f   : > { %v4915_v45 = vcombine.low %v1243_v37, %v1250_v17  ;;  %v1472_v46 = vrot.slane %v1462_v18, %v4784_v16  ;;  %v782_v47 = vcombine.high %v780_v40, %v780_v40  ;;  %v1437_v48 = vrot.slane %v1415_v30, %v4784_v16 }
 0x110   : > { %v1444_v49 = vrot.slane %v1416_v33, %v4784_v16  ;;  %v1465_v50 = vcombine.low %v780_v40, %v781_v43  ;;  %v1486_v51 = vrot.slane %v1464_v44, %v4784_v16  ;;  %v1423_v53 = vrot.slane %v1413_v39, %v4784_v16 }
 0x111   : > { %v1517_v52 = vrot.slane %v782_v47, %v4784_v16  ;;  %v1430_v54 = vrot.slane %v1414_v41, %v4784_v16  ;;  %v1494_v55 = vcombine.low %v1472_v46, %v1479_v42 }
 0x112   : > { %v1493_v56 = vrot.slane %v1465_v50, %v4784_v16  ;;  %1315 = vrot.lane.b32.xlu0 %v4915_v45, %s4644_s6  ;;  %v1446_v58 = vcombine.low %v1437_v48, %v1444_v49 }
 0x113   : > { %v4928_v57 = vrot.slane %v1517_v52, %v4784_v16  ;;  %v1445_v60 = vcombine.low %v1423_v53, %v1430_v54  ;;  %v1502_v61 = vrot.slane %v1494_v55, %v4784_v16 }
 0x114   : > { %v1495_v59 = vcombine.low %v1486_v51, %v1493_v56  ;;  %v1460_v0 = vrot.slane %v1446_v58, %v4784_v16 }
 0x115   : > { %1529 = vrot.lane.b32.xlu1 %v4928_v57, %s4644_s6  ;;  %v1453_v3 = vrot.slane %v1445_v60, %v4784_v16 }
 0x116   : > { %v1509_v62 = vrot.slane %v1495_v59, %v4784_v16  ;;  %1861 = vrot.lane.b32.xlu0 %v4853_v10, %s4645_s7 }
 0x117   : > { %v4944_v4 = vcombine.low %v1453_v3, %v1460_v0 }
 0x118   : > { %v4937_v2 = vcombine.low %v1502_v61, %v1509_v62 }
 0x11a   : > { %1527 = vrot.lane.b32.xlu1 %v4937_v2, %s4644_s6  ;;  %1757 = vrot.lane.b32.xlu0 %v4813_v11, %s4645_s7 }
 0x11e   : > { %1525 = vrot.lane.b32.xlu1 %v4944_v4, %s4644_s6  ;;  %1960 = vrot.lane.b32.xlu0 %v4894_v5, %s4645_s7 }
 0x122   : > { %1761 = vrot.lane.b32.xlu1 %v4822_v26, %s4645_s7  ;;  %1958 = vrot.lane.b32.xlu0 %v4907_v29, %s4645_s7 }
 0x126   : > { %1759 = vrot.lane.b32.xlu1 %v4828_v34, %s4645_s7  ;;  %1956 = vrot.lane.b32.xlu0 %v4915_v45, %s4645_s7 }
 0x12a   : > { %1859 = vrot.lane.b32.xlu1 %v4870_v38, %s4645_s7 }
 0x12e   : > { %1857 = vrot.lane.b32.xlu1 %v4862_v23, %s4645_s7 }
 0x132   : > { %2059 = vrot.lane.b32.xlu1 %v4928_v57, %s4645_s7 }
 0x136   : > { %2055 = vrot.lane.b32.xlu1 %v4944_v4, %s4645_s7 }
 0x13a   : > { %2057 = vrot.lane.b32.xlu1 %v4937_v2, %s4645_s7 }
 0x161   : > { %v896_v7 = vpop.permute.xlu1 %895 }
 0x164   : > { %v900_v16 = vpop.permute.xlu0 %899 }
 0x165   : > { %4041 = vmatpush3.xpose.msk.msra.mxu1 %vm220_vm1, %v900_v16 }
 0x166   : > { %4042 = vmatprep.subr.mxu1 %v4641_v1 }
 0x168   : > { %v898_v6 = vpop.permute.xlu0 %897 }
 0x169   : > { %4043 = vmatpush3.xpose.msk.msra.mxu1 %vm220_vm1, %v898_v6 }
 0x16a   : > { %4044 = vmatprep.subr.mxu1 %v4641_v1 }
 0x16d   : > { %4045 = vmatpush3.xpose.msk.msra.mxu1 %vm220_vm1, %v896_v7  ;;  %v1110_v63 = vpop.permute.xlu1 %1109 }
 0x16e   : > { %4055 = vmatprep.subr.mxu1 %v4641_v1 }
 0x170   : > { %4047 = vmatmul.mubr.msk.f32.vlgmr.msra.gmra.mxu1 %vm220_vm1, %v4813_v11 }
 0x171   : > { %4056 = vmatpush3.xpose.msk.msra.mxu1 %vm220_vm1, %v1110_v63  ;;  %4049 = vmatprep.mubr.msk.f32.mxu1 %vm4642_vm0, %v4641_v1  ;;  %v1106_v9 = vpop.permute.xlu1 %1105 }
 0x172   : > { %4057 = vmatprep.subr.mxu1 %v4641_v1 }
 0x174   : > { %4050 = vmatmul.mubr.msk.f32.gmra.mxu1 %vm220_vm1, %v4828_v34 }
 0x175   : > { %v1108_v8 = vpop.permute.xlu0 %1107  ;;  %4052 = vmatprep.mubr.msk.f32.mxu1 %vm4642_vm0, %v4641_v1 }
 0x176   : > { %4058 = vmatpush3.xpose.msk.msra.mxu1 %vm220_vm1, %v1108_v8 }
 0x177   : > { %4059 = vmatprep.subr.mxu1 %v4641_v1 }
 0x178   : > { %4053 = vmatmul.mubr.msk.f32.gmra.mxu1 %vm220_vm1, %v4822_v26 }
 0x179   : > { %4061 = vmatprep.mubr.msk.f32.mxu1 %vm4642_vm0, %v4641_v1 }
 0x17a   : > { %4060 = vmatpush3.xpose.msk.msra.mxu1 %vm220_vm1, %v1106_v9 }
 0x17b   : > { %4070 = vmatprep.subr.mxu1 %v4641_v1  ;;  %v1320_v12 = vpop.permute.xlu0 %1319 }
 0x17d   : > { %4062 = vmatmul.mubr.msk.f32.vlgmr.msra.gmra.mxu1 %vm220_vm1, %v4862_v23 }
 0x17e   : > { %4071 = vmatpush3.xpose.msk.msra.mxu1 %vm220_vm1, %v1320_v12  ;;  %4064 = vmatprep.mubr.msk.f32.mxu1 %vm4642_vm0, %v4641_v1 }
 0x17f   : > { %4072 = vmatprep.subr.mxu1 %v4641_v1 }
 0x180   : > { %v1318_v13 = vpop.permute.xlu0 %1317 }
 0x181   : > { %4065 = vmatmul.mubr.msk.f32.gmra.mxu1 %vm220_vm1, %v4870_v38 }
 0x182   : > { %4067 = vmatprep.mubr.msk.f32.mxu1 %vm4642_vm0, %v4641_v1  ;;  %4073 = vmatpush3.xpose.msk.msra.mxu1 %vm220_vm1, %v1318_v13 }
 0x183   : > { %4074 = vmatprep.subr.mxu1 %v4641_v1 }
 0x184   : > { %v1316_v14 = vpop.permute.xlu0 %1315 }
 0x185   : > { %4068 = vmatmul.mubr.msk.f32.gmra.mxu1 %vm220_vm1, %v4853_v10 }
 0x186   : > { %4076 = vmatprep.mubr.msk.f32.mxu1 %vm4642_vm0, %v4641_v1  ;;  %4075 = vmatpush3.xpose.msk.msra.mxu1 %vm220_vm1, %v1316_v14 }
 0x187   : > { %4100 = vmatprep.subr.mxu1 %v4641_v1  ;;  %v1530_v17 = vpop.permute.xlu1 %1529 }
 0x188   : > { %4086 = vmatpush3.xpose.msk.msra.mxu0 %vm220_vm1, %v1530_v17  ;;  %v1862_v21 = vpop.permute.xlu0 %1861 }
 0x189   : > { %4077 = vmatmul.mubr.msk.f32.vlgmr.msra.gmra.mxu1 %vm220_vm1, %v4915_v45  ;;  %4087 = vmatprep.subr.mxu0 %v4641_v1 }
 0x18a   : > { %4079 = vmatprep.mubr.msk.f32.mxu1 %vm4642_vm0, %v4641_v1 }
 0x18c   : > { %v1528_v19 = vpop.permute.xlu1 %1527  ;;  %v1758_v25 = vpop.permute.xlu0 %1757 }
 0x18d   : > { %4080 = vmatmul.mubr.msk.f32.gmra.mxu1 %vm220_vm1, %v4907_v29  ;;  %4088 = vmatpush3.xpose.msk.msra.mxu0 %vm220_vm1, %v1528_v19 }
 0x18e   : > { %4082 = vmatprep.mubr.msk.f32.mxu1 %vm4642_vm0, %v4641_v1  ;;  %4089 = vmatprep.subr.mxu0 %v4641_v1 }
 0x190   : > { %v1526_v20 = vpop.permute.xlu1 %1525  ;;  %v5116_v8 = vpop.permute.xlu0 %1960 }
 0x191   : > { %4083 = vmatmul.mubr.msk.f32.gmra.mxu1 %vm220_vm1, %v4894_v5  ;;  %4090 = vmatpush3.xpose.msk.msra.mxu0 %vm220_vm1, %v1526_v20 }
 0x192   : > { %4106 = vmatprep.mubr.msk.f32.mxu1 %vm4642_vm0, %v4641_v1  ;;  %4115 = vmatprep.subr.mxu0 %v4641_v1 }
 0x194   : > { %4092 = vmatmul.mubr.msk.f32.vlgmr.msra.gmra.mxu0 %vm220_vm1, %v4944_v4  ;;  %v1762_v22 = vpop.permute.xlu1 %1761  ;;  %v5118_v9 = vpop.permute.xlu0 %1958 }
 0x195   : > { %4101 = vmatpush3.msk.msra.mxu1 %vm1774_vm2, %v1762_v22  ;;  %4116 = vmatpush3.msk.msra.mxu0 %vm1774_vm2, %v1862_v21 }
 0x196   : > { %4094 = vmatprep.mubr.msk.f32.mxu0 %vm4642_vm0, %v4641_v1  ;;  %4102 = vmatprep.subr.mxu1 %v4641_v1 }
 0x197   : > { %4117 = vmatprep.subr.mxu0 %v4641_v1 }
 0x198   : > { %4095 = vmatmul.mubr.msk.f32.gmra.mxu0 %vm220_vm1, %v4937_v2  ;;  %v1760_v24 = vpop.permute.xlu1 %1759  ;;  %v5122_v13 = vpop.permute.xlu0 %1956 }
 0x199   : > { %4103 = vmatpush3.msra.mxu1 %v1760_v24  ;;  %4097 = vmatprep.mubr.msk.f32.mxu0 %vm4642_vm0, %v4641_v1 }
 0x19a   : > { %4104 = vmatprep.subr.mxu1 %v4641_v1 }
 0x19b   : > { %4105 = vmatpush3.msra.mxu1 %v1758_v25 }
 0x19c   : > { %4098 = vmatmul.mubr.msk.f32.gmra.mxu0 %vm220_vm1, %v4928_v57  ;;  %v1860_v27 = vpop.permute.xlu1 %1859  ;;  %4130 = vmatprep.subr.mxu1 %v4641_v1 }
 0x19d   : > { %4118 = vmatpush3.msra.mxu0 %v1860_v27  ;;  %4121 = vmatprep.mubr.msk.f32.mxu0 %vm4642_vm0, %v4641_v1 }
 0x19e   : > { %4119 = vmatprep.subr.mxu0 %v4641_v1 }
 0x1a0   : > { %v1858_v28 = vpop.permute.xlu1 %1857 }
 0x1a1   : > { %4120 = vmatpush3.msra.mxu0 %v1858_v28 }
 0x1a2   : > { %4145 = vmatprep.subr.mxu0 %v4641_v1 }
 0x1a4   : > { %v5120_v12 = vpop.permute.xlu1 %2059 }
 0x1a8   : > { %v5124_v14 = vpop.permute.xlu1 %2055 }
 0x1ac   : > { %v5127_v21 = vpop.permute.xlu1 %2057 }
 0x230   : > { %v5048_v30 = vpop.f32.mrf.mxu1 }
 0x231   : > { %v1624_v31 = vsel %vm1623_vm3, %v5048_v30, -inf }
 0x232   : > { %v4048_v32 = vpop.f32.mrf.mxu1  ;;  %1625 = vmax.xlane.f32.xlu0 %v1624_v31 }
 0x234   : > { %v5052_v33 = vpop.f32.mrf.mxu1 }
 0x235   : > { %v1627_v35 = vsel %vm1623_vm3, %v5052_v33, -inf }
 0x236   : > { %v4051_v36 = vpop.f32.mrf.mxu1  ;;  %1628 = vmax.xlane.f32.xlu0 %v1627_v35 }
 0x238   : > { %v5056_v37 = vpop.f32.mrf.mxu1 }
 0x239   : > { %v1631_v39 = vsel %vm1630_vm4, %v5056_v37, -inf }
 0x23a   : > { %v4054_v18 = vpop.f32.mrf.mxu1  ;;  %1632 = vmax.xlane.f32.xlu1 %v1631_v39 }
 0x23d   : > { %v5060_v40 = vpop.f32.mrf.mxu1 }
 0x23e   : > { %v1634_v41 = vsel %vm1623_vm3, %v5060_v40, -inf }
 0x23f   : > { %v4063_v42 = vpop.f32.mrf.mxu1  ;;  %1635 = vmax.xlane.f32.xlu1 %v1634_v41 }
 0x241   : > { %v5064_v43 = vpop.f32.mrf.mxu1 }
 0x242   : > { %v1637_v44 = vsel %vm1623_vm3, %v5064_v43, -inf }
 0x243   : > { %v4066_v46 = vpop.f32.mrf.mxu1  ;;  %1638 = vmax.xlane.f32.xlu0 %v1637_v44 }
 0x245   : > { %v5068_v47 = vpop.f32.mrf.mxu1 }
 0x246   : > { %v1640_v48 = vsel %vm1630_vm4, %v5068_v47, -inf }
 0x247   : > { %v4069_v49 = vpop.f32.mrf.mxu1  ;;  %1641 = vmax.xlane.f32.xlu0 %v1640_v48 }
 0x249   : > { %v5072_v50 = vpop.f32.mrf.mxu1 }
 0x24a   : > { %v1643_v51 = vsel %vm1623_vm3, %v5072_v50, -inf }
 0x24b   : > { %v4078_v52 = vpop.f32.mrf.mxu1  ;;  %1644 = vmax.xlane.f32.xlu1 %v1643_v51 }
 0x24d   : > { %v5076_v53 = vpop.f32.mrf.mxu1 }
 0x24e   : > { %v1646_v54 = vsel %vm1623_vm3, %v5076_v53, -inf }
 0x24f   : > { %v4081_v55 = vpop.f32.mrf.mxu1  ;;  %1647 = vmax.xlane.f32.xlu1 %v1646_v54 }
 0x251   : > { %v5080_v56 = vpop.f32.mrf.mxu1 }
 0x252   : > { %v1649_v58 = vsel %vm1630_vm4, %v5080_v56, -inf }
 0x253   : > { %v4084_v59 = vpop.f32.mrf.mxu1  ;;  %1650 = vmax.xlane.f32.xlu1 %v1649_v58 }
 0x254   : > { %v5084_v60 = vpop.f32.mrf.mxu0 }
 0x255   : > { %v1652_v61 = vsel %vm1623_vm3, %v5084_v60, -inf }
 0x256   : > { %1653 = vmax.xlane.f32.xlu0 %v1652_v61  ;;  %v4093_v62 = vpop.f32.mrf.mxu0 }
 0x258   : > { %v5088_v0 = vpop.f32.mrf.mxu0 }
 0x259   : > { %v1655_v3 = vsel %vm1623_vm3, %v5088_v0, -inf }
 0x25a   : > { %1656 = vmax.xlane.f32.xlu0 %v1655_v3  ;;  %v4096_v16 = vpop.f32.mrf.mxu0 }
 0x25c   : > { %v5092_v6 = vpop.f32.mrf.mxu0 }
 0x25d   : > { %v1658_v7 = vsel %vm1630_vm4, %v5092_v6, -inf }
 0x25e   : > { %1659 = vmax.xlane.f32.xlu0 %v1658_v7  ;;  %v4099_v63 = vpop.f32.mrf.mxu0 }
 0x264   : > { %2548 = vrot.lane.b32.xlu1 %v4853_v10, %s4646_s8 }
 0x268   : > { %2546 = vrot.lane.b32.xlu1 %v4870_v38, %s4646_s8 }
 0x26c   : > { %2544 = vrot.lane.b32.xlu1 %v4862_v23, %s4646_s8 }
 0x270   : > { %2538 = vrot.lane.b32.xlu1 %v4862_v23, %s4647_s9 }
 0x274   : > { %2756 = vrot.lane.b32.xlu1 %v4928_v57, %s4646_s8  ;;  %2444 = vrot.lane.b32.xlu0 %v4822_v26, %s4646_s8 }
 0x278   : > { %2442 = vrot.lane.b32.xlu0 %v4828_v34, %s4646_s8 }
 0x27c   : > { %2440 = vrot.lane.b32.xlu0 %v4813_v11, %s4646_s8 }
 0x280   : > { %2434 = vrot.lane.b32.xlu0 %v4813_v11, %s4647_s9 }
 0x284   : > { %2652 = vrot.lane.b32.xlu0 %v4894_v5, %s4646_s8 }
 0x2bb   : > { %v1626_v17 = vpop.xlane.xlu0 %1625 }
 0x2bc   : > { %v1661_v19 = vsub.f32 %v5048_v30, %v1626_v17 }
 0x2be   : > { %v1673_v20 = vmul.f32 1.442695, %v1661_v19 }
 0x2bf   : > { %v1629_v22 = vpop.xlane.xlu0 %1628 }
 0x2c0   : > { %4437 = vpow2.f32 %v1673_v20  ;;  %v1662_v24 = vsub.f32 %v5052_v33, %v1629_v22 }
 0x2c2   : > { %v1675_v25 = vmul.f32 1.442695, %v1662_v24 }
 0x2c3   : > { %v1633_v27 = vpop.xlane.xlu1 %1632 }
 0x2c4   : > { %4439 = vpow2.f32 %v1675_v25  ;;  %v1663_v28 = vsub.f32 %v5056_v37, %v1633_v27 }
 0x2c6   : > { %v1677_v31 = vmul.f32 1.442695, %v1663_v28 }
 0x2c8   : > { %4441 = vpow2.f32 %v1677_v31  ;;  %v1636_v32 = vpop.xlane.xlu1 %1635 }
 0x2c9   : > { %v1664_v35 = vsub.f32 %v5060_v40, %v1636_v32 }
 0x2cb   : > { %v1679_v36 = vmul.f32 1.442695, %v1664_v35 }
 0x2cc   : > { %v1639_v39 = vpop.xlane.xlu0 %1638 }
 0x2cd   : > { %v5132_v30 = vpop.eup %4437  ;;  %4443 = vpow2.f32 %v1679_v36  ;;  %v1665_v18 = vsub.f32 %v5064_v43, %v1639_v39 }
 0x2ce   : > { %v1697_v33 = vsel %vm1623_vm3, %v5132_v30, 0.0 }
 0x2cf   : > { %v1681_v41 = vmul.f32 1.442695, %v1665_v18  ;;  %1698 = vadd.xlane.f32.xlu1 %v1697_v33 }
 0x2d0   : > { %v1642_v42 = vpop.xlane.xlu0 %1641 }
 0x2d1   : > { %v5137_v44 = vpop.eup %4439  ;;  %4445 = vpow2.f32 %v1681_v41  ;;  %v1666_v37 = vsub.f32 %v5068_v47, %v1642_v42 }
 0x2d2   : > { %v1700_v40 = vsel %vm1623_vm3, %v5137_v44, 0.0 }
 0x2d3   : > { %v1683_v46 = vmul.f32 1.442695, %v1666_v37  ;;  %1701 = vadd.xlane.f32.xlu1 %v1700_v40 }
 0x2d4   : > { %v1645_v43 = vpop.xlane.xlu1 %1644 }
 0x2d5   : > { %v5142_v48 = vpop.eup %4441  ;;  %4447 = vpow2.f32 %v1683_v46  ;;  %v1667_v49 = vsub.f32 %v5072_v50, %v1645_v43 }
 0x2d6   : > { %v1703_v51 = vsel %vm1630_vm4, %v5142_v48, 0.0 }
 0x2d7   : > { %1704 = vadd.xlane.f32.xlu1 %v1703_v51  ;;  %v1685_v52 = vmul.f32 1.442695, %v1667_v49 }
 0x2d8   : > { %v1648_v54 = vpop.xlane.xlu1 %1647 }
 0x2d9   : > { %4449 = vpow2.f32 %v1685_v52  ;;  %v1668_v47 = vsub.f32 %v5076_v53, %v1648_v54 }
 0x2da   : > { %v5147_v55 = vpop.eup %4443 }
 0x2db   : > { %v1706_v58 = vsel %vm1623_vm3, %v5147_v55, 0.0  ;;  %v1687_v59 = vmul.f32 1.442695, %v1668_v47 }
 0x2dc   : > { %1707 = vadd.xlane.f32.xlu0 %v1706_v58  ;;  %v1651_v61 = vpop.xlane.xlu1 %1650 }
 0x2dd   : > { %4451 = vpow2.f32 %v1687_v59  ;;  %v1669_v50 = vsub.f32 %v5080_v56, %v1651_v61 }
 0x2de   : > { %v5152_v62 = vpop.eup %4445 }
 0x2df   : > { %v1709_v3 = vsel %vm1623_vm3, %v5152_v62, 0.0  ;;  %v1689_v16 = vmul.f32 1.442695, %v1669_v50  ;;  %v1654_v7 = vpop.xlane.xlu0 %1653 }
 0x2e0   : > { %1710 = vadd.xlane.f32.xlu0 %v1709_v3  ;;  %v1670_v53 = vsub.f32 %v5084_v60, %v1654_v7 }
 0x2e1   : > { %4453 = vpow2.f32 %v1689_v16 }
 0x2e2   : > { %v5157_v63 = vpop.eup %4447  ;;  %v1691_v19 = vmul.f32 1.442695, %v1670_v53 }
 0x2e3   : > { %v1712_v17 = vsel %vm1630_vm4, %v5157_v63, 0.0  ;;  %v1657_v20 = vpop.xlane.xlu0 %1656 }
 0x2e4   : > { %1713 = vadd.xlane.f32.xlu0 %v1712_v17  ;;  %4455 = vpow2.f32 %v1691_v19  ;;  %v1671_v56 = vsub.f32 %v5088_v0, %v1657_v20 }
 0x2e6   : > { %v5163_v22 = vpop.eup %4449  ;;  %v1693_v24 = vmul.f32 1.442695, %v1671_v56 }
 0x2e7   : > { %v1715_v25 = vsel %vm1623_vm3, %v5163_v22, 0.0  ;;  %v1660_v27 = vpop.xlane.xlu0 %1659 }
 0x2e8   : > { %1716 = vadd.xlane.f32.xlu1 %v1715_v25  ;;  %4457 = vpow2.f32 %v1693_v24  ;;  %v1672_v60 = vsub.f32 %v5092_v6, %v1660_v27 }
 0x2ea   : > { %v5168_v28 = vpop.eup %4451  ;;  %v1695_v31 = vmul.f32 1.442695, %v1672_v60 }
 0x2eb   : > { %v1718_v32 = vsel %vm1623_vm3, %v5168_v28, 0.0  ;;  %v5234_v42 = vpop.permute.xlu0 %2444 }
 0x2ec   : > { %1719 = vadd.xlane.f32.xlu1 %v1718_v32  ;;  %4459 = vpow2.f32 %v1695_v31 }
 0x2ee   : > { %v5172_v0 = vpop.eup %4453 }
 0x2ef   : > { %v1721_v35 = vsel %vm1630_vm4, %v5172_v0, 0.0 }
 0x2f0   : > { %1722 = vadd.xlane.f32.xlu1 %v1721_v35 }
 0x2f1   : > { %v5176_v36 = vpop.eup %4455 }
 0x2f2   : > { %v1724_v39 = vsel %vm1623_vm3, %v5176_v36, 0.0 }
 0x2f3   : > { %1725 = vadd.xlane.f32.xlu0 %v1724_v39 }
 0x2f5   : > { %v5180_v6 = vpop.eup %4457 }
 0x2f6   : > { %v1727_v18 = vsel %vm1623_vm3, %v5180_v6, 0.0 }
 0x2f7   : > { %1728 = vadd.xlane.f32.xlu0 %v1727_v18 }
 0x2f9   : > { %v5184_v33 = vpop.eup %4459 }
 0x2fa   : > { %v1730_v41 = vsel %vm1630_vm4, %v5184_v33, 0.0 }
 0x2fb   : > { %1731 = vadd.xlane.f32.xlu0 %v1730_v41 }
 0x301   : > { %2540 = vrot.lane.b32.xlu1 %v4870_v38, %s4647_s9 }
 0x305   : > { %2754 = vrot.lane.b32.xlu1 %v4937_v2, %s4646_s8 }
 0x309   : > { %2542 = vrot.lane.b32.xlu1 %v4853_v10, %s4647_s9 }
 0x30d   : > { %2752 = vrot.lane.b32.xlu1 %v4944_v4, %s4646_s8 }
 0x311   : > { %2746 = vrot.lane.b32.xlu1 %v4944_v4, %s4647_s9  ;;  %2436 = vrot.lane.b32.xlu0 %v4828_v34, %s4647_s9 }
 0x315   : > { %2748 = vrot.lane.b32.xlu1 %v4937_v2, %s4647_s9  ;;  %2650 = vrot.lane.b32.xlu0 %v4907_v29, %s4646_s8 }
 0x319   : > { %2750 = vrot.lane.b32.xlu1 %v4928_v57, %s4647_s9  ;;  %2438 = vrot.lane.b32.xlu0 %v4822_v26, %s4647_s9 }
 0x31d   : > { %2986 = vrot.lane.b32.xlu1 %v4822_v26, %s4648_s10  ;;  %2648 = vrot.lane.b32.xlu0 %v4915_v45, %s4646_s8  ;;  %v5228_v26 = vpop.permute.xlu1 %2548 }
 0x321   : > { %2984 = vrot.lane.b32.xlu1 %v4828_v34, %s4648_s10  ;;  %2642 = vrot.lane.b32.xlu0 %v4915_v45, %s4647_s9  ;;  %v5230_v34 = vpop.permute.xlu1 %2546 }
 0x325   : > { %2982 = vrot.lane.b32.xlu1 %v4813_v11, %s4648_s10  ;;  %2644 = vrot.lane.b32.xlu0 %v4907_v29, %s4647_s9  ;;  %v5232_v11 = vpop.permute.xlu1 %2544 }
 0x329   : > { %3081 = vrot.lane.b32.xlu1 %v4862_v23, %s4648_s10  ;;  %2646 = vrot.lane.b32.xlu0 %v4894_v5, %s4647_s9  ;;  %v5236_v37 = vpop.permute.xlu1 %2538  ;;  %v5238_v23 = vpop.permute.xlu0 %2442 }
 0x32d   : > { %3085 = vrot.lane.b32.xlu0 %v4853_v10, %s4648_s10  ;;  %v5240_v40 = vpop.permute.xlu1 %2756  ;;  %v5242_v46 = vpop.permute.xlu0 %2440 }
 0x331   : > { %3083 = vrot.lane.b32.xlu0 %v4870_v38, %s4648_s10  ;;  %v5244_v43 = vpop.permute.xlu0 %2434 }
 0x335   : > { %v5246_v51 = vpop.permute.xlu0 %2652 }
 0x358   : > { %v1699_v10 = vpop.xlane.xlu1 %1698 }
 0x359   : > { %4461 = vrcp.f32 %v1699_v10 }
 0x35c   : > { %v1702_v38 = vpop.xlane.xlu1 %1701 }
 0x35d   : > { %4463 = vrcp.f32 %v1702_v38 }
 0x360   : > { %v1705_v49 = vpop.xlane.xlu1 %1704 }
 0x361   : > { %4465 = vrcp.f32 %v1705_v49 }
 0x365   : > { %v1708_v52 = vpop.xlane.xlu0 %1707 }
 0x366   : > { %v4462_v54 = vpop.eup %4461  ;;  %4467 = vrcp.f32 %v1708_v52 }
 0x367   : > { %v1745_v47 = vmul.f32 %v4462_v54, %v5132_v30 }
 0x369   : > { %v1711_v58 = vpop.xlane.xlu0 %1710  ;;  %4107 = vmatmul.mubr.msk.f32.vlgmr.msra.gmra.mxu1 %vm1623_vm3, %v1745_v47 }
 0x36a   : > { %v4464_v59 = vpop.eup %4463  ;;  %4469 = vrcp.f32 %v1711_v58  ;;  %4131 = vmatpush3.msk.msra.mxu1 %vm1774_vm2, %v5116_v8  ;;  %4109 = vmatprep.mubr.msk.f32.mxu1 %vm4642_vm0, %v4641_v1 }
 0x36b   : > { %4132 = vmatprep.subr.mxu1 %v4641_v1  ;;  %v1746_v61 = vmul.f32 %v4464_v59, %v5137_v44 }
 0x36c   : > { %4133 = vmatpush3.msra.mxu1 %v5118_v9 }
 0x36d   : > { %4134 = vmatprep.subr.mxu1 %v4641_v1  ;;  %v1714_v30 = vpop.xlane.xlu0 %1713  ;;  %4110 = vmatmul.mubr.msk.f32.gmra.mxu1 %vm1623_vm3, %v1746_v61 }
 0x36e   : > { %v4466_v50 = vpop.eup %4465  ;;  %4471 = vrcp.f32 %v1714_v30  ;;  %4135 = vmatpush3.msra.mxu1 %v5122_v13  ;;  %4112 = vmatprep.mubr.msk.f32.mxu1 %vm4642_vm0, %v4641_v1 }
 0x36f   : > { %v1747_v8 = vmul.f32 %v4466_v50, %v5142_v48  ;;  %4160 = vmatprep.subr.mxu1 %v4641_v1 }
 0x371   : > { %4113 = vmatmul.mubr.msk.f32.gmra.mxu1 %vm1623_vm3, %v1747_v8  ;;  %v1717_v44 = vpop.xlane.xlu1 %1716 }
 0x372   : > { %4136 = vmatprep.mubr.msk.f32.mxu1 %vm4642_vm0, %v4641_v1  ;;  %4473 = vrcp.f32 %v1717_v44 }
 0x373   : > { %v4468_v9 = vpop.eup %4467 }
 0x374   : > { %v1748_v3 = vmul.f32 %v4468_v9, %v5147_v55 }
 0x375   : > { %v1720_v16 = vpop.xlane.xlu1 %1719 }
 0x376   : > { %4122 = vmatmul.mubr.msk.f32.vlgmr.msra.gmra.mxu0 %vm1623_vm3, %v1748_v3  ;;  %4475 = vrcp.f32 %v1720_v16 }
 0x377   : > { %v4470_v13 = vpop.eup %4469  ;;  %4146 = vmatpush3.msk.msra.mxu0 %vm1774_vm2, %v5120_v12  ;;  %4124 = vmatprep.mubr.msk.f32.mxu0 %vm4642_vm0, %v4641_v1 }
 0x378   : > { %4147 = vmatprep.subr.mxu0 %v4641_v1  ;;  %v1749_v48 = vmul.f32 %v4470_v13, %v5152_v62 }
 0x379   : > { %4148 = vmatpush3.msra.mxu0 %v5127_v21  ;;  %v1723_v7 = vpop.xlane.xlu1 %1722 }
 0x37a   : > { %4149 = vmatprep.subr.mxu0 %v4641_v1  ;;  %4125 = vmatmul.mubr.msk.f32.gmra.mxu0 %vm1623_vm3, %v1749_v48  ;;  %4477 = vrcp.f32 %v1723_v7 }
 0x37b   : > { %v4472_v55 = vpop.eup %4471  ;;  %4150 = vmatpush3.msra.mxu0 %v5124_v14  ;;  %4127 = vmatprep.mubr.msk.f32.mxu0 %vm4642_vm0, %v4641_v1 }
 0x37c   : > { %v1750_v12 = vmul.f32 %v4472_v55, %v5157_v63  ;;  %4175 = vmatprep.subr.mxu0 %v4641_v1  ;;  %v1726_v53 = vpop.xlane.xlu0 %1725 }
 0x37d   : > { %v5283_v62 = vpop.permute.xlu1 %2540  ;;  %4479 = vrcp.f32 %v1726_v53 }
 0x37e   : > { %4128 = vmatmul.mubr.msk.f32.gmra.mxu0 %vm1623_vm3, %v1750_v12 }
 0x37f   : > { %4151 = vmatprep.mubr.msk.f32.mxu0 %vm4642_vm0, %v4641_v1  ;;  %v4474_v21 = vpop.eup %4473 }
 0x380   : > { %v1751_v17 = vmul.f32 %v4474_v21, %v5163_v22  ;;  %v1729_v14 = vpop.xlane.xlu0 %1728 }
 0x381   : > { %v5289_v19 = vpop.permute.xlu1 %2754  ;;  %4481 = vrcp.f32 %v1729_v14 }
 0x382   : > { %4137 = vmatmul.mubr.msk.f32.vlgmr.msra.gmra.mxu1 %vm1623_vm3, %v1751_v17 }
 0x383   : > { %v4476_v63 = vpop.eup %4475  ;;  %4161 = vmatpush3.xpose.msk.msra.mxu1 %vm220_vm1, %v5234_v42  ;;  %4139 = vmatprep.mubr.msk.f32.mxu1 %vm4642_vm0, %v4641_v1 }
 0x384   : > { %4162 = vmatprep.subr.mxu1 %v4641_v1  ;;  %v1752_v20 = vmul.f32 %v4476_v63, %v5168_v28  ;;  %v1732_v56 = vpop.xlane.xlu0 %1731 }
 0x385   : > { %v5298_v24 = vpop.permute.xlu1 %2542  ;;  %4483 = vrcp.f32 %v1732_v56 }
 0x386   : > { %4140 = vmatmul.mubr.msk.f32.gmra.mxu1 %vm1623_vm3, %v1752_v20 }
 0x387   : > { %v4478_v22 = vpop.eup %4477  ;;  %4163 = vmatpush3.xpose.msk.msra.mxu1 %vm220_vm1, %v5238_v23  ;;  %4142 = vmatprep.mubr.msk.f32.mxu1 %vm4642_vm0, %v4641_v1 }
 0x388   : > { %4164 = vmatprep.subr.mxu1 %v4641_v1  ;;  %v1753_v25 = vmul.f32 %v4478_v22, %v5172_v0  ;;  %v2437_v27 = vpop.permute.xlu0 %2436 }
 0x389   : > { %v5307_v60 = vpop.permute.xlu1 %2752 }
 0x38a   : > { %4143 = vmatmul.mubr.msk.f32.gmra.mxu1 %vm1623_vm3, %v1753_v25  ;;  %v4480_v28 = vpop.eup %4479 }
 0x38b   : > { %4165 = vmatpush3.xpose.msk.msra.mxu1 %vm220_vm1, %v5242_v46  ;;  %4166 = vmatprep.mubr.msk.f32.mxu1 %vm4642_vm0, %v4641_v1  ;;  %v1754_v31 = vmul.f32 %v4480_v28, %v5176_v36  ;;  %v4649_v28 = vmov 1983009808  }
 0x38c   : > { %4190 = vmatprep.subr.mxu1 %v4641_v1  ;;  %v2651_v32 = vpop.permute.xlu0 %2650 }
 0x38d   : > { %v5316_v35 = vpop.permute.xlu1 %2746  ;;  %4152 = vmatmul.mubr.msk.f32.vlgmr.msra.gmra.mxu0 %vm1623_vm3, %v1754_v31  ;;  %v2210_v31 = vunpack.c.l.s4 %v4649_v28 }
 0x38e   : > { %4167 = vmatmul.mubr.msk.f32.vlgmr.msra.gmra.mxu1 %vm220_vm1, %v5244_v43  ;;  %v4482_v0 = vpop.eup %4481  ;;  %4176 = vmatpush3.xpose.msk.msra.mxu0 %vm220_vm1, %v5228_v26 }
 0x38f   : > { %4154 = vmatprep.mubr.msk.f32.mxu0 %vm4642_vm0, %v4641_v1  ;;  %4177 = vmatprep.subr.mxu0 %v4641_v1  ;;  %v1755_v36 = vmul.f32 %v4482_v0, %v5180_v6 }
 0x390   : > { %4191 = vmatpush3.xpose.msk.msra.mxu1 %vm220_vm1, %v5246_v51  ;;  %v2439_v39 = vpop.permute.xlu0 %2438  ;;  %4169 = vmatprep.mubr.msk.f32.mxu1 %vm4642_vm0, %v4641_v1 }
 0x391   : > { %v2749_v18 = vpop.permute.xlu1 %2748  ;;  %4192 = vmatprep.subr.mxu1 %v4641_v1  ;;  %4155 = vmatmul.mubr.msk.f32.gmra.mxu0 %vm1623_vm3, %v1755_v36 }
 0x392   : > { %4170 = vmatmul.mubr.msk.f32.gmra.mxu1 %vm220_vm1, %v2437_v27  ;;  %v4484_v41 = vpop.eup %4483  ;;  %4178 = vmatpush3.xpose.msk.msra.mxu0 %vm220_vm1, %v5230_v34 }
 0x393   : > { %4157 = vmatprep.mubr.msk.f32.mxu0 %vm4642_vm0, %v4641_v1  ;;  %4179 = vmatprep.subr.mxu0 %v4641_v1  ;;  %v1756_v6 = vmul.f32 %v4484_v41, %v5184_v33 }
 0x394   : > { %4193 = vmatpush3.xpose.msk.msra.mxu1 %vm220_vm1, %v2651_v32  ;;  %v2649_v26 = vpop.permute.xlu0 %2648  ;;  %4172 = vmatprep.mubr.msk.f32.mxu1 %vm4642_vm0, %v4641_v1 }
 0x395   : > { %v2751_v42 = vpop.permute.xlu1 %2750  ;;  %4194 = vmatprep.subr.mxu1 %v4641_v1  ;;  %4158 = vmatmul.mubr.msk.f32.gmra.mxu0 %vm1623_vm3, %v1756_v6 }
 0x396   : > { %4173 = vmatmul.mubr.msk.f32.gmra.mxu1 %vm220_vm1, %v2439_v39  ;;  %4180 = vmatpush3.xpose.msk.msra.mxu0 %vm220_vm1, %v5232_v11 }
 0x397   : > { %4181 = vmatprep.mubr.msk.f32.mxu0 %vm4642_vm0, %v4641_v1  ;;  %4205 = vmatprep.subr.mxu0 %v4641_v1 }
 0x398   : > { %4195 = vmatpush3.xpose.msk.msra.mxu1 %vm220_vm1, %v2649_v26  ;;  %v2643_v33 = vpop.permute.xlu0 %2642  ;;  %4196 = vmatprep.mubr.msk.f32.mxu1 %vm4642_vm0, %v4641_v1 }
 0x399   : > { %v2987_v34 = vpop.permute.xlu1 %2986  ;;  %4220 = vmatprep.subr.mxu1 %v4641_v1  ;;  %4182 = vmatmul.mubr.msk.f32.vlgmr.msra.gmra.mxu0 %vm220_vm1, %v5236_v37 }
 0x39a   : > { %4206 = vmatpush3.xpose.msk.msra.mxu0 %vm220_vm1, %v5240_v40  ;;  %4184 = vmatprep.mubr.msk.f32.mxu0 %vm4642_vm0, %v4641_v1 }
 0x39b   : > { %4207 = vmatprep.subr.mxu0 %v4641_v1  ;;  %4197 = vmatmul.mubr.msk.f32.vlgmr.msra.gmra.mxu1 %vm220_vm1, %v2643_v33  ;;  %v2211_v33 = vunpack.c.0.s8 %v2210_v31 }
 0x39c   : > { %v2645_v11 = vpop.permute.xlu0 %2644  ;;  %4221 = vmatpush3.msk.msra.mxu1 %vm1774_vm2, %v2987_v34  ;;  %4199 = vmatprep.mubr.msk.f32.mxu1 %vm4642_vm0, %v4641_v1 }
 0x39d   : > { %v2985_v23 = vpop.permute.xlu1 %2984  ;;  %4185 = vmatmul.mubr.msk.f32.gmra.mxu0 %vm220_vm1, %v5283_v62  ;;  %4222 = vmatprep.subr.mxu1 %v4641_v1 }
 0x39e   : > { %4208 = vmatpush3.xpose.msk.msra.mxu0 %vm220_vm1, %v5289_v19  ;;  %4187 = vmatprep.mubr.msk.f32.mxu0 %vm4642_vm0, %v4641_v1 }
 0x39f   : > { %4209 = vmatprep.subr.mxu0 %v4641_v1  ;;  %4200 = vmatmul.mubr.msk.f32.gmra.mxu1 %vm220_vm1, %v2645_v11 }
 0x3a0   : > { %v2647_v37 = vpop.permute.xlu0 %2646  ;;  %4223 = vmatpush3.msra.mxu1 %v2985_v23  ;;  %4202 = vmatprep.mubr.msk.f32.mxu1 %vm4642_vm0, %v4641_v1 }
 0x3a1   : > { %4188 = vmatmul.mubr.msk.f32.gmra.mxu0 %vm220_vm1, %v5298_v24  ;;  %v2983_v40 = vpop.permute.xlu1 %2982  ;;  %4224 = vmatprep.subr.mxu1 %v4641_v1 }
 0x3a2   : > { %4210 = vmatpush3.xpose.msk.msra.mxu0 %vm220_vm1, %v5307_v60  ;;  %4211 = vmatprep.mubr.msk.f32.mxu0 %vm4642_vm0, %v4641_v1 }
 0x3a3   : > { %4235 = vmatprep.subr.mxu0 %v4641_v1  ;;  %4203 = vmatmul.mubr.msk.f32.gmra.mxu1 %vm220_vm1, %v2647_v37 }
 0x3a4   : > { %v3086_v46 = vpop.permute.xlu0 %3085  ;;  %4225 = vmatpush3.msra.mxu1 %v2983_v40  ;;  %4226 = vmatprep.mubr.msk.f32.mxu1 %vm4642_vm0, %v4641_v1 }
 0x3a5   : > { %4212 = vmatmul.mubr.msk.f32.vlgmr.msra.gmra.mxu0 %vm220_vm1, %v5316_v35  ;;  %4250 = vmatprep.subr.mxu1 %v4641_v1  ;;  %v3082_v43 = vpop.permute.xlu1 %3081 }
 0x3a6   : > { %4236 = vmatpush3.msk.msra.mxu0 %vm1774_vm2, %v3086_v46  ;;  %4214 = vmatprep.mubr.msk.f32.mxu0 %vm4642_vm0, %v4641_v1 }
 0x3a7   : > { %4237 = vmatprep.subr.mxu0 %v4641_v1 }
 0x3a8   : > { %v3084_v10 = vpop.permute.xlu0 %3083 }
 0x3a9   : > { %4215 = vmatmul.mubr.msk.f32.gmra.mxu0 %vm220_vm1, %v2749_v18 }
 0x3aa   : > { %4238 = vmatpush3.msra.mxu0 %v3084_v10  ;;  %4217 = vmatprep.mubr.msk.f32.mxu0 %vm4642_vm0, %v4641_v1 }
 0x3ab   : > { %4239 = vmatprep.subr.mxu0 %v4641_v1 }
 0x3ac   : > { %4240 = vmatpush3.msra.mxu0 %v3082_v43 }
 0x3ad   : > { %4218 = vmatmul.mubr.msk.f32.gmra.mxu0 %vm220_vm1, %v2751_v42  ;;  %4265 = vmatprep.subr.mxu0 %v4641_v1 }
 0x3ae   : > { %4241 = vmatprep.mubr.msk.f32.mxu0 %vm4642_vm0, %v4641_v1 }
 0x429   : > { %v1843_v38 = vpop.f32.mrf.mxu1 }
 0x42a   : > { %v2179_v52 = vrot.slane %v1843_v38, 1 }
 0x42b   : > { %v4108_v49 = vpop.f32.mrf.mxu1 }
 0x42d   : > { %v1848_v51 = vpop.f32.mrf.mxu1 }
 0x42e   : > { %v2180_v54 = vrot.slane %v1848_v51, 1 }
 0x42f   : > { %v4111_v47 = vpop.f32.mrf.mxu1 }
 0x430   : > { %v5404_v58 = vsel %vm2178_vm5, %v2179_v52, %v2180_v54 }
 0x431   : > { %v1853_v59 = vpop.f32.mrf.mxu1 }
 0x432   : > { %v2182_v61 = vrot.slane %v1853_v59, 1 }
 0x433   : > { %v4114_v30 = vpop.f32.mrf.mxu1 }
 0x434   : > { %v5407_v50 = vsel %vm2178_vm5, %v2180_v54, %v2182_v61 }
 0x436   : > { %v1942_v8 = vpop.f32.mrf.mxu0 }
 0x437   : > { %v2184_v3 = vrot.slane %v1942_v8, 1  ;;  %v2158_v20 = vrot.slane %v1942_v8, 7 }
 0x438   : > { %v4123_v44 = vpop.f32.mrf.mxu0 }
 0x439   : > { %v2160_v35 = vsel %vm2159_vm6, %v2158_v20, %v1843_v38  ;;  %v5440_v38 = vsub.s32 %v2211_v33, %v4781_v15 }
 0x43a   : > { %v1947_v9 = vpop.f32.mrf.mxu0 }
 0x43b   : > { %v2185_v16 = vrot.slane %v1947_v9, 1 }
 0x43c   : > { %v4126_v13 = vpop.f32.mrf.mxu0 }
 0x43d   : > { %v2186_v48 = vsel %vm2178_vm5, %v2184_v3, %v2185_v16 }
 0x43e   : > { %v1952_v7 = vpop.f32.mrf.mxu0 }
 0x43f   : > { %v2187_v55 = vrot.slane %v1952_v7, 1 }
 0x440   : > { %v4129_v12 = vpop.f32.mrf.mxu0 }
 0x441   : > { %v5411_v53 = vsel %vm2178_vm5, %v2185_v16, %v2187_v55 }
 0x442   : > { %v2041_v62 = vpop.f32.mrf.mxu1 }
 0x443   : > { %v2189_v14 = vrot.slane %v2041_v62, 1  ;;  %v2161_v24 = vrot.slane %v2041_v62, 6 }
 0x444   : > { %v4138_v21 = vpop.f32.mrf.mxu1 }
 0x445   : > { %v2163_v36 = vsel %vm2162_vm7, %v2161_v24, %v2160_v35 }
 0x446   : > { %v2046_v17 = vpop.f32.mrf.mxu1 }
 0x447   : > { %v2190_v19 = vrot.slane %v2046_v17, 1 }
 0x448   : > { %v4141_v63 = vpop.f32.mrf.mxu1 }
 0x449   : > { %v2191_v56 = vsel %vm2178_vm5, %v2189_v14, %v2190_v19 }
 0x44a   : > { %v2207_v22 = vcombine.low %v5404_v58, %v2191_v56  ;;  %v2208_v25 = vcombine.high %v5404_v58, %v2191_v56  ;;  %v2051_v27 = vpop.f32.mrf.mxu1 }
 0x44b   : > { %v2192_v60 = vrot.slane %v2051_v27, 1 }
 0x44c   : > { %v4144_v32 = vpop.f32.mrf.mxu1  ;;  %v5446_v30 = vrot.slane %v2207_v22, %v5440_v38 }
 0x44d   : > { %v2193_v0 = vsel %vm2178_vm5, %v2190_v19, %v2192_v60  ;;  %v2140_v39 = vpop.f32.mrf.mxu0 }
 0x44e   : > { %v2275_v18 = vcombine.low %v5407_v50, %v2193_v0  ;;  %v2276_v41 = vcombine.high %v5407_v50, %v2193_v0  ;;  %v5425_v6 = vpop.f32.mrf.mxu1  ;;  %v2164_v26 = vrot.slane %v2140_v39, 5  ;;  %v2194_v46 = vrot.slane %v2140_v39, 1 }
 0x44f   : > { %v2850_v42 = vsel %vm1623_vm3, %v5425_v6, -inf  ;;  %v4153_v34 = vpop.f32.mrf.mxu0  ;;  %v5449_v50 = vrot.slane %v2208_v25, %v5440_v38 }
 0x450   : > { %2851 = vmax.xlane.f32.xlu0 %v2850_v42  ;;  %v4168_v11 = vpop.f32.mrf.mxu1  ;;  %v2166_v23 = vsel %vm2165_vm8, %v2164_v26, %v2163_v36  ;;  %v5470_v14 = vrot.slane %v2275_v18, %v5440_v38  ;;  %v5475_v20 = vrot.slane %v2276_v41, %v5440_v38 }
 0x451   : > { %v2145_v37 = vpop.f32.mrf.mxu0  ;;  %2169 = vst.msk [vmem:[%s5434_s19] sm:$0xf] %vm2168_vm9, %v2166_v23 }
 0x452   : > { %v5430_v40 = vpop.f32.mrf.mxu1  ;;  %v2195_v10 = vrot.slane %v2145_v37, 1 }
 0x453   : > { %v2853_v43 = vsel %vm1623_vm3, %v5430_v40, -inf  ;;  %v4156_v49 = vpop.f32.mrf.mxu0 }
 0x454   : > { %2854 = vmax.xlane.f32.xlu0 %v2853_v43  ;;  %v4171_v51 = vpop.f32.mrf.mxu1  ;;  %v2196_v52 = vsel %vm2178_vm5, %v2194_v46, %v2195_v10 }
 0x455   : > { %v2223_v54 = vcombine.low %v2186_v48, %v2196_v52  ;;  %v2224_v47 = vcombine.high %v2186_v48, %v2196_v52  ;;  %v2150_v58 = vpop.f32.mrf.mxu0 }
 0x456   : > { %v5443_v59 = vpop.f32.mrf.mxu1  ;;  %v2197_v61 = vrot.slane %v2150_v58, 1 }
 0x457   : > { %v5452_v8 = vrot.slane %v2223_v54, %v5440_v38  ;;  %v5455_v44 = vrot.slane %v2224_v47, %v5440_v38  ;;  %v4159_v9 = vpop.f32.mrf.mxu0 }
 0x458   : > { %v4174_v3 = vpop.f32.mrf.mxu1  ;;  %v2198_v16 = vsel %vm2178_vm5, %v2195_v10, %v2197_v61 }
 0x459   : > { %v2239_v13 = vcombine.low %v5446_v30, %v5452_v8  ;;  %v2240_v48 = vcombine.high %v5446_v30, %v5452_v8  ;;  %v2255_v7 = vcombine.low %v5449_v50, %v5455_v44  ;;  %v2256_v55 = vcombine.high %v5449_v50, %v5455_v44  ;;  %v2628_v12 = vpop.f32.mrf.mxu0 }
 0x45a   : > { %v2291_v62 = vcombine.low %v5411_v53, %v2198_v16  ;;  %v2292_v21 = vcombine.high %v5411_v53, %v2198_v16  ;;  %v2859_v17 = vsel %vm1623_vm3, %v2628_v12, -inf  ;;  %v2856_v53 = vsel %vm1630_vm4, %v5443_v59, -inf }
 0x45b   : > { %2860 = vmax.xlane.f32.xlu1 %v2859_v17  ;;  %v4183_v19 = vpop.f32.mrf.mxu0  ;;  %v5472_v63 = vpop.f32.mrf.mxu1 }
 0x45c   : > { %v5478_v56 = vrot.slane %v2291_v62, %v5440_v38  ;;  %v5481_v24 = vrot.slane %v2292_v21, %v5440_v38  ;;  %v2868_v36 = vsel %vm1623_vm3, %v5472_v63, -inf }
 0x45d   : > { %v2633_v22 = vpop.f32.mrf.mxu0  ;;  %v4198_v25 = vpop.f32.mrf.mxu1 }
 0x45e   : > { %v2307_v27 = vcombine.low %v5470_v14, %v5478_v56  ;;  %v2308_v60 = vcombine.high %v5470_v14, %v5478_v56  ;;  %v2323_v28 = vcombine.low %v5475_v20, %v5481_v24  ;;  %v2324_v31 = vcombine.high %v5475_v20, %v5481_v24 }
 0x45f   : > { %v4186_v32 = vpop.f32.mrf.mxu0  ;;  %2857 = vmax.xlane.f32.xlu1 %v2856_v53  ;;  %v2862_v35 = vsel %vm1623_vm3, %v2633_v22, -inf  ;;  %v5494_v0 = vpop.f32.mrf.mxu1 }
 0x460   : > { %2863 = vmax.xlane.f32.xlu0 %v2862_v35  ;;  %v2871_v33 = vsel %vm1623_vm3, %v5494_v0, -inf }
 0x461   : > { %v2638_v39 = vpop.f32.mrf.mxu0  ;;  %v4201_v18 = vpop.f32.mrf.mxu1 }
 0x462   : > { %v2865_v26 = vsel %vm1630_vm4, %v2638_v39, -inf }
 0x463   : > { %v4189_v41 = vpop.f32.mrf.mxu0  ;;  %2869 = vmax.xlane.f32.xlu1 %v2868_v36  ;;  %v5499_v42 = vpop.f32.mrf.mxu1 }
 0x464   : > { %2866 = vmax.xlane.f32.xlu0 %v2865_v26  ;;  %v2874_v52 = vsel %vm1630_vm4, %v5499_v42, -inf }
 0x465   : > { %v2836_v34 = vpop.f32.mrf.mxu0  ;;  %v4204_v11 = vpop.f32.mrf.mxu1 }
 0x466   : > { %v2877_v37 = vsel %vm1623_vm3, %v2836_v34, -inf }
 0x467   : > { %v4213_v23 = vpop.f32.mrf.mxu0  ;;  %2872 = vmax.xlane.f32.xlu1 %v2871_v33 }
 0x468   : > { %2878 = vmax.xlane.f32.xlu0 %v2877_v37 }
 0x469   : > { %v2841_v46 = vpop.f32.mrf.mxu0 }
 0x46a   : > { %v2880_v43 = vsel %vm1623_vm3, %v2841_v46, -inf }
 0x46b   : > { %v4216_v10 = vpop.f32.mrf.mxu0 }
 0x46c   : > { %2881 = vmax.xlane.f32.xlu0 %v2880_v43 }
 0x46d   : > { %v5505_v49 = vpop.f32.mrf.mxu0 }
 0x46e   : > { %v2883_v54 = vsel %vm1630_vm4, %v5505_v49, -inf }
 0x46f   : > { %v4219_v51 = vpop.f32.mrf.mxu0 }
 0x478   : > { %3283 = vrot.lane.b32.xlu1 %v4928_v57, %s4648_s10 }
 0x482   : > { %3184 = vrot.lane.b32.xlu0 %v4894_v5, %s4648_s10 }
 0x49c   : > { %2875 = vmax.xlane.f32.xlu1 %v2874_v52 }
 0x4a1   : > { %2884 = vmax.xlane.f32.xlu0 %v2883_v54 }
 0x4ad   : > { %3281 = vrot.lane.b32.xlu1 %v4937_v2, %s4648_s10 }
 0x4b7   : > { %3182 = vrot.lane.b32.xlu0 %v4907_v29, %s4648_s10 }
 0x4d9   : > { %v2852_v47 = vpop.xlane.xlu0 %2851 }
 0x4da   : > { %v2886_v57 = vsub.f32 %v5425_v6, %v2852_v47 }
 0x4dc   : > { %v2898_v58 = vmul.f32 1.442695, %v2886_v57 }
 0x4dd   : > { %v2855_v61 = vpop.xlane.xlu0 %2854 }
 0x4de   : > { %4485 = vpow2.f32 %v2898_v58  ;;  %v2887_v5 = vsub.f32 %v5430_v40, %v2855_v61 }
 0x4e0   : > { %v2900_v9 = vmul.f32 1.442695, %v2887_v5 }
 0x4e2   : > { %4487 = vpow2.f32 %v2900_v9 }
 0x4e4   : > { %v2861_v3 = vpop.xlane.xlu1 %2860 }
 0x4e5   : > { %v2889_v16 = vsub.f32 %v2628_v12, %v2861_v3 }
 0x4e7   : > { %v2904_v62 = vmul.f32 1.442695, %v2889_v16 }
 0x4e8   : > { %v2858_v21 = vpop.xlane.xlu1 %2857 }
 0x4e9   : > { %4489 = vpow2.f32 %v2904_v62  ;;  %v2888_v2 = vsub.f32 %v5443_v59, %v2858_v21  ;;  %v2864_v17 = vpop.xlane.xlu0 %2863 }
 0x4ea   : > { %v2890_v29 = vsub.f32 %v2633_v22, %v2864_v17 }
 0x4eb   : > { %v5522_v19 = vpop.eup %4485  ;;  %v2902_v53 = vmul.f32 1.442695, %v2888_v2 }
 0x4ec   : > { %v2922_v6 = vsel %vm1623_vm3, %v5522_v19, 0.0  ;;  %v2906_v25 = vmul.f32 1.442695, %v2890_v29  ;;  %v2870_v32 = vpop.xlane.xlu1 %2869 }
 0x4ed   : > { %2923 = vadd.xlane.f32.xlu1 %v2922_v6  ;;  %4491 = vpow2.f32 %v2902_v53  ;;  %v2892_v40 = vsub.f32 %v5472_v63, %v2870_v32  ;;  %v2867_v12 = vpop.xlane.xlu0 %2866 }
 0x4ee   : > { %4493 = vpow2.f32 %v2906_v25  ;;  %v2891_v36 = vsub.f32 %v2638_v39, %v2867_v12 }
 0x4ef   : > { %v5527_v35 = vpop.eup %4487  ;;  %v2910_v59 = vmul.f32 1.442695, %v2892_v40 }
 0x4f0   : > { %v2925_v18 = vsel %vm1623_vm3, %v5527_v35, 0.0  ;;  %v2908_v22 = vmul.f32 1.442695, %v2891_v36  ;;  %v2873_v41 = vpop.xlane.xlu1 %2872 }
 0x4f1   : > { %2926 = vadd.xlane.f32.xlu1 %v2925_v18  ;;  %4495 = vpow2.f32 %v2910_v59  ;;  %v2893_v26 = vsub.f32 %v5494_v0, %v2873_v41  ;;  %v2879_v33 = vpop.xlane.xlu0 %2878 }
 0x4f2   : > { %4497 = vpow2.f32 %v2908_v22  ;;  %v2895_v11 = vsub.f32 %v2836_v34, %v2879_v33 }
 0x4f3   : > { %v2912_v23 = vmul.f32 1.442695, %v2893_v26 }
 0x4f4   : > { %v2916_v63 = vmul.f32 1.442695, %v2895_v11  ;;  %v3284_v21 = vpop.permute.xlu1 %3283 }
 0x4f5   : > { %4499 = vpow2.f32 %v2912_v23  ;;  %v2882_v37 = vpop.xlane.xlu0 %2881 }
 0x4f6   : > { %v5532_v10 = vpop.eup %4489  ;;  %4501 = vpow2.f32 %v2916_v63  ;;  %v2896_v39 = vsub.f32 %v2841_v46, %v2882_v37 }
 0x4f7   : > { %v2931_v43 = vsel %vm1623_vm3, %v5532_v10, 0.0 }
 0x4f8   : > { %v2918_v51 = vmul.f32 1.442695, %v2896_v39  ;;  %2932 = vadd.xlane.f32.xlu0 %v2931_v43 }
 0x4f9   : > { %v3185_v17 = vpop.permute.xlu0 %3184 }
 0x4fa   : > { %v5536_v52 = vpop.eup %4491  ;;  %4503 = vpow2.f32 %v2918_v51 }
 0x4fb   : > { %v5538_v0 = vpop.eup %4493  ;;  %v2928_v34 = vsel %vm1630_vm4, %v5536_v52, 0.0 }
 0x4fc   : > { %2929 = vadd.xlane.f32.xlu1 %v2928_v34  ;;  %v2934_v54 = vsel %vm1623_vm3, %v5538_v0, 0.0 }
 0x4fd   : > { %2935 = vadd.xlane.f32.xlu0 %v2934_v54 }
 0x4fe   : > { %v5544_v47 = vpop.eup %4495 }
 0x4ff   : > { %v5546_v46 = vpop.eup %4497  ;;  %v2940_v57 = vsel %vm1623_vm3, %v5544_v47, 0.0 }
 0x500   : > { %2941 = vadd.xlane.f32.xlu1 %v2940_v57  ;;  %v2937_v58 = vsel %vm1630_vm4, %v5546_v46, 0.0 }
 0x501   : > { %2938 = vadd.xlane.f32.xlu0 %v2937_v58 }
 0x502   : > { %v5552_v61 = vpop.eup %4499 }
 0x503   : > { %v5554_v5 = vpop.eup %4501  ;;  %v2943_v9 = vsel %vm1623_vm3, %v5552_v61, 0.0 }
 0x504   : > { %2944 = vadd.xlane.f32.xlu1 %v2943_v9  ;;  %v2949_v3 = vsel %vm1623_vm3, %v5554_v5, 0.0 }
 0x505   : > { %2950 = vadd.xlane.f32.xlu0 %v2949_v3 }
 0x507   : > { %v5560_v16 = vpop.eup %4503 }
 0x508   : > { %v2952_v62 = vsel %vm1623_vm3, %v5560_v16, 0.0 }
 0x509   : > { %2953 = vadd.xlane.f32.xlu0 %v2952_v62 }
 0x525   : > { %v2876_v2 = vpop.xlane.xlu1 %2875 }
 0x526   : > { %v2894_v29 = vsub.f32 %v5499_v42, %v2876_v2 }
 0x528   : > { %v2914_v53 = vmul.f32 1.442695, %v2894_v29 }
 0x529   : > { %v3282_v42 = vpop.permute.xlu1 %3281 }
 0x52a   : > { %4505 = vpow2.f32 %v2914_v53  ;;  %v2885_v6 = vpop.xlane.xlu0 %2884 }
 0x52b   : > { %v2897_v25 = vsub.f32 %v5505_v49, %v2885_v6 }
 0x52d   : > { %v2920_v32 = vmul.f32 1.442695, %v2897_v25 }
 0x52e   : > { %v3183_v22 = vpop.permute.xlu0 %3182 }
 0x52f   : > { %4507 = vpow2.f32 %v2920_v32 }
 0x537   : > { %v5566_v40 = vpop.eup %4505 }
 0x538   : > { %v2946_v12 = vsel %vm1630_vm4, %v5566_v40, 0.0 }
 0x539   : > { %2947 = vadd.xlane.f32.xlu1 %v2946_v12 }
 0x53c   : > { %v5570_v36 = vpop.eup %4507 }
 0x53d   : > { %v2955_v59 = vsel %vm1630_vm4, %v5570_v36, 0.0  ;;  %vm2424_vm4 = vcmask 785408  }
 0x53e   : > { %2956 = vadd.xlane.f32.xlu0 %v2955_v59 }
 0x54a   : > { %3279 = vrot.lane.b32.xlu1 %v4944_v4, %s4648_s10 }
 0x554   : > { %3180 = vrot.lane.b32.xlu0 %v4915_v45, %s4648_s10 }
 0x576   : > { %v2924_v49 = vpop.xlane.xlu1 %2923 }
 0x577   : > { %4509 = vrcp.f32 %v2924_v49 }
 0x57a   : > { %v2927_v18 = vpop.xlane.xlu1 %2926 }
 0x57b   : > { %4511 = vrcp.f32 %v2927_v18 }
 0x581   : > { %v2933_v41 = vpop.xlane.xlu0 %2932 }
 0x582   : > { %4513 = vrcp.f32 %v2933_v41 }
 0x584   : > { %v4510_v26 = vpop.eup %4509 }
 0x585   : > { %v2970_v33 = vmul.f32 %v4510_v26, %v5522_v19  ;;  %v2930_v11 = vpop.xlane.xlu1 %2929 }
 0x586   : > { %4515 = vrcp.f32 %v2930_v11  ;;  %v2936_v23 = vpop.xlane.xlu0 %2935 }
 0x587   : > { %4227 = vmatmul.mubr.msk.f32.vlgmr.msra.gmra.mxu1 %vm1623_vm3, %v2970_v33  ;;  %4517 = vrcp.f32 %v2936_v23 }
 0x588   : > { %v4512_v4 = vpop.eup %4511  ;;  %4251 = vmatpush3.msk.msra.mxu1 %vm1774_vm2, %v3185_v17  ;;  %4229 = vmatprep.mubr.msk.f32.mxu1 %vm4642_vm0, %v4641_v1 }
 0x589   : > { %4252 = vmatprep.subr.mxu1 %v4641_v1  ;;  %v2971_v45 = vmul.f32 %v4512_v4, %v5527_v35 }
 0x58a   : > { %4253 = vmatpush3.msra.mxu1 %v3183_v22  ;;  %v2939_v63 = vpop.xlane.xlu0 %2938 }
 0x58b   : > { %4230 = vmatmul.mubr.msk.f32.gmra.mxu1 %vm1623_vm3, %v2971_v45  ;;  %4254 = vmatprep.subr.mxu1 %v4641_v1  ;;  %4519 = vrcp.f32 %v2939_v63 }
 0x58c   : > { %4232 = vmatprep.mubr.msk.f32.mxu1 %vm4642_vm0, %v4641_v1 }
 0x58f   : > { %v4514_v19 = vpop.eup %4513 }
 0x590   : > { %v2973_v37 = vmul.f32 %v4514_v19, %v5532_v10 }
 0x592   : > { %4242 = vmatmul.mubr.msk.f32.vlgmr.msra.gmra.mxu0 %vm1623_vm3, %v2973_v37 }
 0x593   : > { %v4516_v39 = vpop.eup %4515  ;;  %4266 = vmatpush3.msk.msra.mxu0 %vm1774_vm2, %v3284_v21  ;;  %4244 = vmatprep.mubr.msk.f32.mxu0 %vm4642_vm0, %v4641_v1  ;;  %vm2420_vm2 = vcmask 654336  }
 0x594   : > { %v4518_v35 = vpop.eup %4517  ;;  %4267 = vmatprep.subr.mxu0 %v4641_v1  ;;  %v2972_v43 = vmul.f32 %v4516_v39, %v5536_v52  ;;  %v2951_v52 = vpop.xlane.xlu0 %2950  ;;  %v4650_v39 = vmov 1934713408  }
 0x595   : > { %4268 = vmatpush3.msra.mxu0 %v3282_v42  ;;  %v2974_v51 = vmul.f32 %v4518_v35, %v5538_v0  ;;  %v2942_v0 = vpop.xlane.xlu1 %2941  ;;  %4521 = vrcp.f32 %v2951_v52  ;;  %v2242_v35 = vunpack.c.l.s4 %v4650_v39 }
 0x596   : > { %4233 = vmatmul.mubr.msk.f32.gmra.mxu1 %vm1623_vm3, %v2972_v43  ;;  %4269 = vmatprep.subr.mxu0 %v4641_v1 }
 0x597   : > { %4245 = vmatmul.mubr.msk.f32.gmra.mxu0 %vm1623_vm3, %v2974_v51  ;;  %4256 = vmatprep.mubr.msk.f32.mxu1 %vm4642_vm0, %v4641_v1  ;;  %v2243_v51 = vunpack.c.0.s8 %v2242_v35 }
 0x598   : > { %v4520_v10 = vpop.eup %4519  ;;  %4247 = vmatprep.mubr.msk.f32.mxu0 %vm4642_vm0, %v4641_v1  ;;  %v2954_v54 = vpop.xlane.xlu0 %2953 }
 0x599   : > { %v2975_v34 = vmul.f32 %v4520_v10, %v5546_v46  ;;  %4523 = vrcp.f32 %v2954_v54  ;;  %v2945_v57 = vpop.xlane.xlu1 %2944  ;;  %v5642_v54 = vsub.s32 %v2243_v51, %v4781_v15 }
 0x59a   : > { %4525 = vrcp.f32 %v2942_v0 }
 0x59b   : > { %4248 = vmatmul.mubr.msk.f32.gmra.mxu0 %vm1623_vm3, %v2975_v34  ;;  %4527 = vrcp.f32 %v2945_v57  ;;  %v5655_v15 = vrot.slane %v2239_v13, %v5642_v54  ;;  %v5670_v30 = vrot.slane %v2256_v55, %v5642_v54 }
 0x59c   : > { %4271 = vmatprep.mubr.msk.f32.mxu0 %vm4642_vm0, %v4641_v1 }
 0x5a2   : > { %v4522_v9 = vpop.eup %4521 }
 0x5a3   : > { %v2979_v3 = vmul.f32 %v4522_v9, %v5554_v5 }
 0x5a6   : > { %v4524_v46 = vpop.eup %4523 }
 0x5a7   : > { %v4526_v2 = vpop.eup %4525  ;;  %v2980_v17 = vmul.f32 %v4524_v46, %v5560_v16 }
 0x5a8   : > { %v2976_v29 = vmul.f32 %v4526_v2, %v5544_v47  ;;  %v4528_v6 = vpop.eup %4527  ;;  %v2254_v2 = vrot.slane %v2240_v48, %v5642_v54 }
 0x5a9   : > { %v2977_v5 = vmul.f32 %v4528_v6, %v5552_v61  ;;  %v5663_v6 = vrot.slane %v2255_v7, %v5642_v54 }
 0x5aa   : > { %v5675_v7 = vcombine.high %v2254_v2, %v4641_v1 }
 0x5c2   : > { %v2948_v58 = vpop.xlane.xlu1 %2947 }
 0x5c3   : > { %4529 = vrcp.f32 %v2948_v58 }
 0x5c6   : > { %v3280_v62 = vpop.permute.xlu1 %3279 }
 0x5c7   : > { %v2957_v21 = vpop.xlane.xlu0 %2956  ;;  %4270 = vmatpush3.msra.mxu0 %v3280_v62 }
 0x5c8   : > { %4531 = vrcp.f32 %v2957_v21  ;;  %4272 = vmatmul.mubr.msk.f32.vlgmr.msra.gmra.mxu0 %vm1623_vm3, %v2979_v3 }
 0x5c9   : > { %4274 = vmatprep.mubr.msk.f32.mxu0 %vm4642_vm0, %v4641_v1 }
 0x5cb   : > { %v3181_v53 = vpop.permute.xlu0 %3180 }
 0x5cc   : > { %4255 = vmatpush3.msra.mxu1 %v3181_v53  ;;  %4275 = vmatmul.mubr.msk.f32.gmra.mxu0 %vm1623_vm3, %v2980_v17 }
 0x5cd   : > { %4257 = vmatmul.mubr.msk.f32.vlgmr.msra.gmra.mxu1 %vm1623_vm3, %v2976_v29  ;;  %4277 = vmatprep.mubr.msk.f32.mxu0 %vm4642_vm0, %v4641_v1 }
 0x5ce   : > { %4259 = vmatprep.mubr.msk.f32.mxu1 %vm4642_vm0, %v4641_v1 }
 0x5d0   : > { %v4530_v25 = vpop.eup %4529 }
 0x5d1   : > { %4260 = vmatmul.mubr.msk.f32.gmra.mxu1 %vm1623_vm3, %v2977_v5  ;;  %v2978_v47 = vmul.f32 %v4530_v25, %v5566_v40 }
 0x5d2   : > { %4262 = vmatprep.mubr.msk.f32.mxu1 %vm4642_vm0, %v4641_v1  ;;  %vm2416_vm0 = vcmask 523264  }
 0x5d5   : > { %v4532_v16 = vpop.eup %4531  ;;  %4263 = vmatmul.mubr.msk.f32.gmra.mxu1 %vm1623_vm3, %v2978_v47 }
 0x5d6   : > { %v2981_v32 = vmul.f32 %v4532_v16, %v5570_v36 }
 0x5d8   : > { %4278 = vmatmul.mubr.msk.f32.gmra.mxu0 %vm1623_vm3, %v2981_v32  ;;  %vm2422_vm3 = vcmask 719872  }
 0x647   : > { %v3067_v12 = vpop.f32.mrf.mxu1 }
 0x648   : > { %v3401_v49 = vrot.slane %v3067_v12, 1 }
 0x649   : > { %v4228_v59 = vpop.f32.mrf.mxu1 }
 0x64a   : > { %v5679_v59 = vcombine.high %v5663_v6, %v4641_v1 }
 0x64b   : > { %v3072_v42 = vpop.f32.mrf.mxu1 }
 0x64c   : > { %v3402_v61 = vrot.slane %v3072_v42, 1 }
 0x64d   : > { %v4231_v18 = vpop.f32.mrf.mxu1 }
 0x64e   : > { %v3403_v22 = vsel %vm2178_vm5, %v3401_v49, %v3402_v61 }
 0x652   : > { %v3166_v41 = vpop.f32.mrf.mxu0 }
 0x653   : > { %v3382_v40 = vrot.slane %v3166_v41, 7  ;;  %v3406_v62 = vrot.slane %v3166_v41, 1  ;;  %v5690_v41 = vrot.slane %v2307_v27, %v5642_v54  ;;  %v5702_v27 = vrot.slane %v2308_v60, %v5642_v54 }
 0x654   : > { %v4243_v26 = vpop.f32.mrf.mxu0 }
 0x655   : > { %v5630_v33 = vsel %vm2159_vm6, %v3382_v40, %v3067_v12  ;;  %v2271_v12 = vcombine.high %v5655_v15, %v4641_v1  ;;  %v5694_v40 = vcombine.high %v5670_v30, %v4641_v1  ;;  %v2339_v24 = vcombine.high %v5690_v41, %v4641_v1 }
 0x656   : > { %v3077_v11 = vpop.f32.mrf.mxu1  ;;  %vm3391_vm6 = vcmask 126016  }
 0x657   : > { %v3404_v23 = vrot.slane %v3077_v11, 1  ;;  %v5632_v4 = vpop.f32.mrf.mxu0 }
 0x658   : > { %v4234_v36 = vpop.f32.mrf.mxu1  ;;  %v3407_v57 = vrot.slane %v5632_v4, 1 }
 0x659   : > { %v5635_v45 = vsel %vm2178_vm5, %v3402_v61, %v3404_v23  ;;  %v4246_v63 = vpop.f32.mrf.mxu0 }
 0x65a   : > { %v3408_v17 = vsel %vm2178_vm5, %v3406_v62, %v3407_v57 }
 0x65b   : > { %v3176_v19 = vpop.f32.mrf.mxu0 }
 0x65c   : > { %v3409_v61 = vrot.slane %v3176_v19, 1 }
 0x65d   : > { %v4249_v37 = vpop.f32.mrf.mxu0 }
 0x688   : > { %v5637_v43 = vpop.f32.mrf.mxu0 }
 0x689   : > { %v3416_v58 = vrot.slane %v5637_v43, 1 }
 0x68a   : > { %v4273_v10 = vpop.f32.mrf.mxu0 }
 0x68c   : > { %v3369_v34 = vpop.f32.mrf.mxu0 }
 0x68d   : > { %v5639_v52 = vpop.f32.mrf.mxu1  ;;  %v3417_v0 = vrot.slane %v3369_v34, 1  ;;  %v3410_v34 = vsel %vm2178_vm5, %v3407_v57, %v3409_v61 }
 0x68e   : > { %v4276_v9 = vpop.f32.mrf.mxu0  ;;  %v3411_v29 = vrot.slane %v5639_v52, 1 }
 0x68f   : > { %v4258_v3 = vpop.f32.mrf.mxu1  ;;  %v3418_v46 = vsel %vm2178_vm5, %v3416_v58, %v3417_v0 }
 0x690   : > { %v3445_v5 = vcombine.low %v3408_v17, %v3418_v46  ;;  %v3446_v25 = vcombine.high %v3408_v17, %v3418_v46 }
 0x691   : > { %v3270_v21 = vpop.f32.mrf.mxu1 }
 0x692   : > { %v3412_v53 = vrot.slane %v3270_v21, 1  ;;  %v3453_v42 = vrot.slane %v3445_v5, %v5440_v38  ;;  %v3460_v50 = vrot.slane %v3446_v25, %v5440_v38  ;;  %v2338_v25 = vrot.slane %v2324_v31, %v5642_v54 }
 0x693   : > { %v4261_v48 = vpop.f32.mrf.mxu1  ;;  %v2340_v31 = vcombine.high %v5702_v27, %v4641_v1 }
 0x694   : > { %v3413_v47 = vsel %vm2178_vm5, %v3411_v29, %v3412_v53 }
 0x695   : > { %v3429_v8 = vcombine.low %v3403_v22, %v3413_v47  ;;  %v3430_v13 = vcombine.high %v3403_v22, %v3413_v47  ;;  %v3275_v16 = vpop.f32.mrf.mxu1 }
 0x696   : > { %v3414_v32 = vrot.slane %v3275_v16, 1 }
 0x697   : > { %v3437_v44 = vrot.slane %v3429_v8, %v5440_v38  ;;  %v3444_v55 = vrot.slane %v3430_v13, %v5440_v38  ;;  %v4264_v49 = vpop.f32.mrf.mxu1 }
 0x698   : > { %v3415_v18 = vsel %vm2178_vm5, %v3412_v53, %v3414_v32  ;;  %v3374_v22 = vpop.f32.mrf.mxu0 }
 0x699   : > { %v3461_v26 = vcombine.low %v3437_v44, %v3453_v42  ;;  %v3462_v11 = vcombine.high %v3437_v44, %v3453_v42  ;;  %v3477_v23 = vcombine.low %v3444_v55, %v3460_v50  ;;  %v3478_v4 = vcombine.high %v3444_v55, %v3460_v50 }
 0x69a   : > { %v3497_v36 = vcombine.low %v5635_v45, %v3415_v18  ;;  %v3498_v63 = vcombine.high %v5635_v45, %v3415_v18  ;;  %v3419_v19 = vrot.slane %v3374_v22, 1  ;;  %v4279_v37 = vpop.f32.mrf.mxu0 }
 0x69b   : > { %v3476_v39 = vrot.slane %v3462_v11, %v5642_v54  ;;  %v5706_v35 = vrot.slane %v3461_v26, %v5642_v54  ;;  %v3485_v51 = vrot.slane %v3477_v23, %v5642_v54  ;;  %v3492_v10 = vrot.slane %v3478_v4, %v5642_v54 }
 0x69c   : > { %v3505_v45 = vrot.slane %v3497_v36, %v5440_v38  ;;  %v3512_v58 = vrot.slane %v3498_v63, %v5440_v38  ;;  %v3420_v9 = vsel %vm2178_vm5, %v3417_v0, %v3419_v19  ;;  %v3386_v26 = vrot.slane %v5637_v43, 5 }
 0x69d   : > { %v3513_v14 = vcombine.low %v3410_v34, %v3420_v9  ;;  %v3514_v56 = vcombine.high %v3410_v34, %v3420_v9  ;;  %v4362_v60 = vpack.i.bf16 %v3476_v39, %v2254_v2  ;;  %v3493_v3 = vcombine.high %v5706_v35, %v4641_v1 }
 0x69e   : > { %v4367_v62 = vpack.i.bf16 %v3485_v51, %v5663_v6  ;;  %v3494_v46 = vcombine.high %v3476_v39, %v4641_v1  ;;  %v4372_v21 = vpack.i.bf16 %v3492_v10, %v5670_v30  ;;  %v3495_v57 = vcombine.high %v3485_v51, %v4641_v1 }
 0x69f   : > { %v3521_v17 = vrot.slane %v3513_v14, %v5440_v38  ;;  %v3528_v29 = vrot.slane %v3514_v56, %v5440_v38  ;;  %4363 = vrot.lane.b32.xlu1 %v4362_v60, %s4651_s21  ;;  %v4377_v0 = vpack.i.bf16 %v3493_v3, %v2271_v12  ;;  %v3496_v2 = vcombine.high %v3492_v10, %v4641_v1  ;;  %s4660_s21 = smov 72  }
 0x6a0   : > { %v4382_v53 = vpack.i.bf16 %v3494_v46, %v5675_v7  ;;  %v4387_v5 = vpack.i.bf16 %v3495_v57, %v5679_v59  ;;  %v2331_v6 = vrot.slane %v2323_v28, %v5642_v54  ;;  %v2342_v12 = vcombine.high %v2338_v25, %v4641_v1 }
 0x6a1   : > { %v3529_v38 = vcombine.low %v3505_v45, %v3521_v17  ;;  %v3530_v48 = vcombine.high %v3505_v45, %v3521_v17  ;;  %v3545_v47 = vcombine.low %v3512_v58, %v3528_v29  ;;  %v3546_v30 = vcombine.high %v3512_v58, %v3528_v29  ;;  %4378 = vrot.lane.b32.xlu0 %v4377_v0, %s4652_s23 }
 0x6a2   : > { %v4392_v8 = vpack.i.bf16 %v3496_v2, %v5694_v40  ;;  %v2341_v32 = vcombine.high %v2331_v6, %v4641_v1  ;;  %vm2426_vm5 = vcmask 850944  }
 0x6a3   : > { %4368 = vrot.lane.b32.xlu1 %v4367_v62, %s4653_s26  ;;  %v3537_v13 = vrot.slane %v3529_v38, %v5642_v54  ;;  %v3544_v28 = vrot.slane %v3530_v48, %v5642_v54  ;;  %v3553_v16 = vrot.slane %v3545_v47, %v5642_v54  ;;  %v3560_v20 = vrot.slane %v3546_v30, %v5642_v54 }
 0x6a5   : > { %4383 = vrot.lane.b32.xlu0 %v4382_v53, %s4654_s27  ;;  %v4397_v7 = vpack.i.bf16 %v3537_v13, %v5690_v41  ;;  %v4402_v59 = vpack.i.bf16 %v3544_v28, %v5702_v27  ;;  %v3561_v42 = vcombine.high %v3537_v13, %v4641_v1  ;;  %v4407_v50 = vpack.i.bf16 %v3553_v16, %v2331_v6 }
 0x6a6   : > { %v3562_v54 = vcombine.high %v3544_v28, %v4641_v1  ;;  %v4412_v44 = vpack.i.bf16 %v3560_v20, %v2338_v25  ;;  %v3563_v55 = vcombine.high %v3553_v16, %v4641_v1  ;;  %v3564_v49 = vcombine.high %v3560_v20, %v4641_v1 }
 0x6a7   : > { %4373 = vrot.lane.b32.xlu1 %v4372_v21, %s4655_s28  ;;  %v4417_v61 = vpack.i.bf16 %v3561_v42, %v2339_v24  ;;  %v3384_v41 = vrot.slane %v5639_v52, 6  ;;  %s4661_s28 = smov [#allocation2]  }
 0x6a8   : > { %v4422_v18 = vpack.i.bf16 %v3562_v54, %v2340_v31  ;;  %v4427_v22 = vpack.i.bf16 %v3563_v55, %v2341_v32  ;;  %v4432_v40 = vpack.i.bf16 %v3564_v49, %v2342_v12 }
 0x6a9   : > { %4388 = vrot.lane.b32.xlu0 %v4387_v5, %s4656_s29  ;;  %v3385_v1 = vsel %vm2162_vm7, %v3384_v41, %v5630_v33  ;;  %vm2428_vm7 = vcmask 916480   ;;  %s4537_s29 = sshll.u32 %s4661_s28, 4  ;;  %s4538_s29 = int_to_ptr.vmem [resolvable:$false] %s4537_s29 }
 0x6aa   : > { %v3387_v11 = vsel %vm2165_vm8, %v3386_v26, %v3385_v1  ;;  %vm2430_vm8 = vcmask 982016  }
 0x6ab   : > { %4398 = vrot.lane.b32.xlu1 %v4397_v7, %s4657_s30  ;;  %s4539_s30 = scalar_lea.vmem %s4538_s29, 128 }
 0x6ad   : > { %4393 = vrot.lane.b32.xlu0 %v4392_v8, %s4658_s4 }
 0x6af   : > { %4403 = vrot.lane.b32.xlu1 %v4402_v59, %s4659_s5 }
 0x6b1   : > { %4418 = vrot.lane.b32.xlu0 %v4417_v61, %s4660_s21 }
 0x6b3   : > { %4408 = vrot.lane.b32.xlu1 %v4407_v50, %s4645_s7  ;;  %s3663_s7 = sshll.u32 %s5434_s19, 4  ;;  %s5776_s7 = int_to_ptr.vmem [resolvable:$true] %s3663_s7 }
 0x6b4   : > { %s4533_s27 = scalar_lea.vmem %s5776_s7, 64  ;;  %p4540_p1 = scmp.lt.s32.totalorder %s5776_s7, %s4538_s29 }
 0x6b5   : > { %4423 = vrot.lane.b32.xlu0 %v4422_v18, %s4648_s10  ;;  %p4534_p12 = scmp.ne.s32.totalorder %s5776_s7, %s4533_s27  ;;  %p4541_p2 = scmp.lt.s32.totalorder %s4539_s30, %s4533_s27 }
 0x6b7   : > { %4413 = vrot.lane.b32.xlu1 %v4412_v44, %s4644_s6  ;;  %s3899_s6 = sshll.u32 %s4631_s15, 6  ;;  %p4535_p13 = pnand %p4534_p12, %p4724_p4 }
 0x6b8   : > { %s5774_s10 = scalar_lea.hbm %s5864_s2, %s3899_s6  ;;  %p4542_p3 = por %p4541_p2, %p4540_p1 }
 0x6b9   : > { %4428 = vrot.lane.b32.xlu0 %v4427_v22, %s4646_s8  ;;  %p4536_p0 = pneg %p4535_p13 }
 0x6bb   : > { %3388 = vrot.lane.b32.xlu1 %v3387_v11, %s4652_s23  ;;  %s3644_s23 = scalar_lea.sflag [#allocation3], %s5415_s11  ;;  %p4543_p5 = pnand %p4542_p3, %p4536_p0 }
 0x6bd   : > { %4433 = vrot.lane.b32.xlu0 %v4432_v40, %s4647_s9 }
 0x711   : > { %v4364_v52 = vpop.permute.xlu1 %4363 }
 0x712   : > { %v4366_v43 = vunpack.i.h.bf16 %v4364_v52  ;;  %v4365_v37 = vunpack.i.l.bf16 %v4364_v52 }
 0x713   : > { %v4379_v23 = vpop.permute.xlu0 %4378 }
 0x714   : > { %v4381_v4 = vunpack.i.h.bf16 %v4379_v23  ;;  %v4380_v36 = vunpack.i.l.bf16 %v4379_v23 }
 0x715   : > { %v4369_v63 = vpop.permute.xlu1 %4368 }
 0x716   : > { %v3625_v19 = vsel %vm220_vm1, %v5706_v35, %v4381_v4  ;;  %v2403_v33 = vsel %vm220_vm1, %v5655_v15, %v4380_v36  ;;  %v4371_v14 = vunpack.i.h.bf16 %v4369_v63  ;;  %v4370_v56 = vunpack.i.l.bf16 %v4369_v63 }
 0x717   : > { %v4384_v27 = vpop.permute.xlu0 %4383  ;;  %v2405_v10 = vsel %vm2404_vm10, %v2403_v33, %v4365_v37  ;;  %v3626_v34 = vsel %vm2404_vm10, %v3625_v19, %v4366_v43  ;;  %vm2418_vm1 = vcmask 588800  }
 0x718   : > { %v4386_v39 = vunpack.i.h.bf16 %v4384_v27  ;;  %v4385_v51 = vunpack.i.l.bf16 %v4384_v27 }
 0x719   : > { %v4374_v45 = vpop.permute.xlu1 %4373 }
 0x71a   : > { %v2407_v58 = vsel %vm2406_vm11, %v2405_v10, %v4385_v51  ;;  %v3627_v9 = vsel %vm2406_vm11, %v3626_v34, %v4386_v39  ;;  %v4376_v17 = vunpack.i.h.bf16 %v4374_v45  ;;  %v4375_v29 = vunpack.i.l.bf16 %v4374_v45 }
 0x71b   : > { %v4389_v35 = vpop.permute.xlu0 %4388  ;;  %v2409_v15 = vsel %vm2408_vm12, %v2407_v58, %v4370_v56  ;;  %v3628_v62 = vsel %vm2408_vm12, %v3627_v9, %v4371_v14 }
 0x71c   : > { %v4391_v60 = vunpack.i.h.bf16 %v4389_v35  ;;  %v4390_v3 = vunpack.i.l.bf16 %v4389_v35 }
 0x71d   : > { %v4399_v46 = vpop.permute.xlu1 %4398 }
 0x71e   : > { %v2411_v21 = vsel %vm2410_vm13, %v2409_v15, %v4390_v3  ;;  %v3629_v57 = vsel %vm2410_vm13, %v3628_v62, %v4391_v60  ;;  %v4401_v47 = vunpack.i.h.bf16 %v4399_v46  ;;  %v4400_v30 = vunpack.i.l.bf16 %v4399_v46 }
 0x71f   : > { %v4394_v0 = vpop.permute.xlu0 %4393  ;;  %v2413_v5 = vsel %vm2412_vm14, %v2411_v21, %v4375_v29  ;;  %v3630_v6 = vsel %vm2412_vm14, %v3629_v57, %v4376_v17 }
 0x720   : > { %v4396_v2 = vunpack.i.h.bf16 %v4394_v0  ;;  %v4395_v53 = vunpack.i.l.bf16 %v4394_v0 }
 0x721   : > { %v4404_v25 = vpop.permute.xlu1 %4403 }
 0x722   : > { %v2415_v38 = vsel %vm2414_vm15, %v2413_v5, %v4395_v53  ;;  %v3631_v48 = vsel %vm2414_vm15, %v3630_v6, %v4396_v2  ;;  %v4406_v12 = vunpack.i.h.bf16 %v4404_v25  ;;  %v4405_v7 = vunpack.i.l.bf16 %v4404_v25 }
 0x723   : > { %v4419_v8 = vpop.permute.xlu0 %4418  ;;  %v2417_v16 = vsel %vm2416_vm0, %v2415_v38, %v4400_v30  ;;  %v3632_v20 = vsel %vm2416_vm0, %v3631_v48, %v4401_v47 }
 0x724   : > { %v4421_v13 = vunpack.i.h.bf16 %v4419_v8  ;;  %v4420_v28 = vunpack.i.l.bf16 %v4419_v8 }
 0x725   : > { %v4409_v24 = vpop.permute.xlu1 %4408 }
 0x726   : > { %v3633_v31 = vsel %vm2418_vm1, %v3632_v20, %v4421_v13  ;;  %v2419_v32 = vsel %vm2418_vm1, %v2417_v16, %v4420_v28  ;;  %v4411_v18 = vunpack.i.h.bf16 %v4409_v24  ;;  %v4410_v22 = vunpack.i.l.bf16 %v4409_v24 }
 0x727   : > { %v4424_v59 = vpop.permute.xlu0 %4423  ;;  %v2421_v54 = vsel %vm2420_vm2, %v2419_v32, %v4405_v7  ;;  %v3634_v44 = vsel %vm2420_vm2, %v3633_v31, %v4406_v12 }
 0x728   : > { %v4426_v42 = vunpack.i.h.bf16 %v4424_v59  ;;  %v4425_v50 = vunpack.i.l.bf16 %v4424_v59 }
 0x729   : > { %v4414_v55 = vpop.permute.xlu1 %4413 }
 0x72a   : > { %v2423_v49 = vsel %vm2422_vm3, %v2421_v54, %v4425_v50  ;;  %v3635_v61 = vsel %vm2422_vm3, %v3634_v44, %v4426_v42  ;;  %v4416_v36 = vunpack.i.h.bf16 %v4414_v55  ;;  %v4415_v63 = vunpack.i.l.bf16 %v4414_v55 }
 0x72b   : > { %v4429_v40 = vpop.permute.xlu0 %4428  ;;  %v2425_v26 = vsel %vm2424_vm4, %v2423_v49, %v4410_v22  ;;  %v3636_v11 = vsel %vm2424_vm4, %v3635_v61, %v4411_v18 }
 0x72c   : > { %v4431_v41 = vunpack.i.h.bf16 %v4429_v40  ;;  %v4430_v1 = vunpack.i.l.bf16 %v4429_v40 }
 0x72d   : > { %v3389_v52 = vpop.permute.xlu1 %3388 }
 0x72e   : > { %v2427_v23 = vsel %vm2426_vm5, %v2425_v26, %v4430_v1  ;;  %v3637_v4 = vsel %vm2426_vm5, %v3636_v11, %v4431_v41  ;;  %3392 = vst.msk [vmem:[%s5434_s19] sm:$0xf] %vm3391_vm6, %v3389_v52 }
 0x72f   : > { %v4434_v19 = vpop.permute.xlu0 %4433 }
 0x730   : > { %4546 = shalt.err (!%p4543_p5)
}
 0x731   : > { %s4547_s19 = scalar_lea.hbm %s5774_s10, 64  ;;  %s4551_s21 = scalar_lea.hbm %s5864_s2, 128 }
 0x732   : > { %p4548_p6 = scmp.ne.s32.totalorder %s5774_s10, %s4547_s19  ;;  %p4552_p10 = scmp.lt.s32.totalorder %s5774_s10, %s5864_s2 }
 0x733   : > { %p4553_p11 = scmp.lt.s32.totalorder %s4551_s21, %s4547_s19 }
 0x734   : > { %p4549_p7 = pnand %p4548_p6, %p4724_p4 }
 0x735   : > { %p4554_p12 = por %p4553_p11, %p4552_p10 }
 0x736   : > { %p4550_p9 = pneg %p4549_p7 }
 0x738   : > { %p4555_p13 = pnand %p4554_p12, %p4550_p9 }
 0x73a   : > { %4558 = shalt.err (!%p4555_p13)
}
 0x73b   : > { %4281 = dma.vmem_to_hbm [thread:$0]  (%p4724_p4), %s5776_s7, 64, %s5774_s10, %s3644_s23   ;;  %v4436_v33 = vunpack.i.h.bf16 %v4434_v19  ;;  %v4435_v43 = vunpack.i.l.bf16 %v4434_v19  ;;  %v2429_v37 = vsel %vm2428_vm7, %v2427_v23, %v4415_v63  ;;  %v3638_v27 = vsel %vm2428_vm7, %v3637_v4, %v4416_v36 }
 0x73c   : > { %s200_s27 = scalar_lea.vmem [#allocation4], %s3796_s18  ;;  %s5811_s19 = scalar_lea.hbm %s5865_s3, %s3899_s6 }
 0x73d   : > { %s3677_s28 = sshll.u32 %s200_s27, 4  ;;  %v2431_v39 = vsel %vm2430_vm8, %v2429_v37, %v4435_v43  ;;  %v3639_v51 = vsel %vm2430_vm8, %v3638_v27, %v4436_v33  ;;  %s3649_s18 = scalar_lea.sflag [#allocation5], %s5415_s11  ;;  %s5813_s28 = int_to_ptr.vmem [resolvable:$true] %s3677_s28 }
 0x73e   : > { %v2432_v10 = vpack.c.bf16 %v2431_v39, %v2431_v39  ;;  %v3640_v34 = vpack.c.bf16 %v3639_v51, %v3639_v51  ;;  %s4559_s7 = scalar_lea.vmem %s5813_s28, 64  ;;  %s4662_s15 = smov [#allocation4]  }
 0x73f   : > { %p4560_p0 = scmp.ne.s32.totalorder %s5813_s28, %s4559_s7  ;;  %s4563_s10 = sshll.u32 %s4662_s15, 4  ;;  %s4564_s10 = int_to_ptr.vmem [resolvable:$false] %s4563_s10 }
 0x740   : > { %2433 = vst [vmem:[%s200_s27] sm:$0x3] %v2432_v10  ;;  %3896 = vst [vmem:[%s200_s27 + $0x2] sm:$0x3] %v3640_v34  ;;  %s4565_s6 = scalar_lea.vmem %s4564_s10, 128  ;;  %p4566_p3 = scmp.lt.s32.totalorder %s5813_s28, %s4564_s10 }
 0x741   : > { %p4561_p1 = pnand %p4560_p0, %p4724_p4  ;;  %p4567_p5 = scmp.lt.s32.totalorder %s4565_s6, %s4559_s7 }
 0x743   : > { %p4562_p2 = pneg %p4561_p1  ;;  %p4568_p6 = por %p4567_p5, %p4566_p3 }
 0x745   : > { %p4569_p7 = pnand %p4568_p6, %p4562_p2 }
 0x747   : > { %4572 = shalt.err (!%p4569_p7)
}
 0x748   : > { %s4573_s23 = scalar_lea.hbm %s5811_s19, 64  ;;  %s4577_s21 = scalar_lea.hbm %s5865_s3, 128 }
 0x749   : > { %p4574_p9 = scmp.ne.s32.totalorder %s5811_s19, %s4573_s23  ;;  %p4578_p12 = scmp.lt.s32.totalorder %s5811_s19, %s5865_s3 }
 0x74a   : > { %p4579_p13 = scmp.lt.s32.totalorder %s4577_s21, %s4573_s23 }
 0x74b   : > { %p4575_p10 = pnand %p4574_p9, %p4724_p4 }
 0x74c   : > { %p4580_p0 = por %p4579_p13, %p4578_p12 }
 0x74d   : > { %p4576_p11 = pneg %p4575_p10 }
 0x74f   : > { %p4581_p1 = pnand %p4580_p0, %p4576_p11 }
 0x751   : > { %4584 = shalt.err (!%p4581_p1)
}
 0x752   : > { %s4663_s27 = smov 2  }
 0x753   : > { %4282 = dma.vmem_to_hbm [thread:$0]  (%p4724_p4), %s5813_s28, 64, %s5811_s19, %s3649_s18, %s4653_s26, %s4653_s26, %s4663_s27  }
 0x754 PF: > { %p4292_p2 = scmp.ge.s32.totalorder %s4639_s17, 2  ;;  %s3692_s29 = sand.u32 1, %s4619_s12  }
 0x755   : > { %s3693_s30 = scalar_lea.sflag [#allocation3], %s3692_s29 }
 0x756   : > { %p4286_p3 = pnand %p4292_p2, %p4731_p8 }
 0x758   : > { %p4287_p5 = pneg %p4286_p3 }
 0x75a   : > { %4610 = dma.done.wait (%p4287_p5), %s3693_s30, 64  }
 0x75b   : > { %4612 = vsyncadd (%p4287_p5), %s3693_s30, 4294967232  ;;  %s3702_s22 = scalar_lea.sflag [#allocation5], %s3692_s29 }
 0x75c   : > { %4614 = dma.done.wait (%p4287_p5), %s3702_s22, 64  }
 0x75d   : > { %4616 = vsyncadd (%p4287_p5), %s3702_s22, 4294967232  ;;  %s20_s17 = sadd.s32 1, %s4639_s17   ;;  %s5868_s12 = smov %s4623_s13 }
 0x75e   : > { %p17_p6 = scmp.ge.s32.totalorder %s20_s17, 4   ;;  %s5869_s13 = smov %s4627_s14 }
 0x75f   : > { %s5870_s14 = smov %s4737_s25  ;;  %s5871_s15 = smov %s4635_s16 }
 0x760   : > { %s5872_s16 = smov %s5874_s20  ;;  %19 = sbr.rel (!%p17_p6) target bundleno = 6 (0x6), region = 81 }
 0x765   :  { %3707 = vsyncpa [#allocation3], 1 }
 0x766   :  { %3709 = vsyncpa [#allocation3 + $0x1], 1 }
 0x767   :  { %3710 = vsyncpa [#allocation5], 1 }
 0x768   :  { %3712 = vsyncpa [#allocation5 + $0x1], 1 }

</bundles_post_ra>
